<compile_context>
chip_gen: v7x
topology: tpu7x:2x2x1
jax: 0.10.0
libtpu: 0.0.40
codegen_flags: <defaults>
</compile_context>

<pallas_src>
import jax
import jax.numpy as jnp
from jax.experimental import pallas as pl
from jax.experimental.pallas import tpu as pltpu

EPS = 1e-5


def _moments(x, axis, n):
    """Fused one-pass mean / unbiased variance along `axis` (extent = n)."""
    s = jnp.sum(x, axis=axis, keepdims=True)
    sq = jnp.sum(x * x, axis=axis, keepdims=True)
    mu = s * (1.0 / n)
    var = (sq - n * mu * mu) * (1.0 / (n - 1))
    return mu, jnp.maximum(var, 0.0)


def _duan_stats_kernel(src_ref, trg_ref,
                       wq_t_ref, wk_t_ref, wv_t_ref,
                       wq_c_ref, wk_c_ref, wv_c_ref,
                       stats_ref):
    # Per-batch blocks (time-major):
    #   src_ref   : (1, Ts, C)     trg_ref : (1, Tt, C)
    #   w*_ref    : (C, C)         (pre-transposed: feat @ w == nn.Linear)
    #   stats_ref : (1, 8, C) rows = [mu_src, rstd_src, tan_mean, tan_std,
    #                                 can_mean, can_std, 0, 0]
    src = src_ref[0]                  # (Ts, C)
    trg = trg_ref[0]                  # (Tt, C)
    ts, c = src.shape
    tt = trg.shape[0]
    inv_temp = 1.0 / (c ** 0.5)

    # InstanceNorm (over time) of src / trg.
    mu_s, var_s = _moments(src, 0, ts)                      # (1, C)
    rstd_s = jax.lax.rsqrt(var_s + EPS)
    in_src = (src - mu_s) * rstd_s                          # (Ts, C)
    mu_tr, var_tr = _moments(trg, 0, tt)
    in_trg = (trg - mu_tr) * jax.lax.rsqrt(var_tr + EPS)    # (Tt, C)

    # TimeInstanceNorm (over channels) of src / trg.
    mu_cs, var_cs = _moments(src, 1, c)                     # (Ts, 1)
    tn_src = (src - mu_cs) * jax.lax.rsqrt(var_cs + EPS)
    mu_ct, var_ct = _moments(trg, 1, c)
    tn_trg = (trg - mu_ct) * jax.lax.rsqrt(var_ct + EPS)

    def adaptive_stats(q_feat, k_feat, wq, wk, wv):
        q = jnp.dot(q_feat, wq, preferred_element_type=jnp.float32) * inv_temp
        k = jnp.dot(k_feat, wk, preferred_element_type=jnp.float32)
        v = jnp.dot(trg, wv, preferred_element_type=jnp.float32)
        # logits = q @ k^T  (contract channel axis of both -> (Ts, Tt))
        logits = jax.lax.dot_general(q, k, (((1,), (1,)), ((), ())),
                                     preferred_element_type=jnp.float32)
        m = jnp.max(logits, axis=-1, keepdims=True)
        e = jnp.exp(logits - m)
        attn = e / jnp.sum(e, axis=-1, keepdims=True)
        mean_tc = jnp.dot(attn, v, preferred_element_type=jnp.float32)   # (Ts, C)
        ex2 = jnp.dot(attn, v * v, preferred_element_type=jnp.float32)
        var_tc = jnp.maximum(ex2 - mean_tc * mean_tc, 0.0)               # relu
        pooled_mean = jnp.mean(mean_tc, axis=0, keepdims=True)           # (1, C)
        pooled_std = jnp.sqrt(jnp.mean(var_tc, axis=0, keepdims=True))   # (1, C)
        return pooled_mean, pooled_std

    tan_mean, tan_std = adaptive_stats(tn_src, tn_trg,
                                       wq_t_ref[...], wk_t_ref[...], wv_t_ref[...])
    can_mean, can_std = adaptive_stats(in_src, in_trg,
                                       wq_c_ref[...], wk_c_ref[...], wv_c_ref[...])

    stats_ref[0, 0:1, :] = mu_s
    stats_ref[0, 1:2, :] = rstd_s
    stats_ref[0, 2:3, :] = tan_mean
    stats_ref[0, 3:4, :] = tan_std
    stats_ref[0, 4:5, :] = can_mean
    stats_ref[0, 5:6, :] = can_std
    stats_ref[0, 6:8, :] = jnp.zeros((2, c), jnp.float32)


def _duan_apply_kernel(src_ref, stats_ref, w1_ref, w2_ref, bias_ref, out_ref):
    # src_ref : (1, T_tile, C)    stats_ref : (1, 8, C)
    # w1/w2   : (C, C) halves of the 1x1-conv weight, pre-transposed
    # bias_ref: (1, C)            out_ref   : (1, T_tile, C)
    x = src_ref[0]                               # (T_tile, C)
    stats = stats_ref[0]                         # (8, C)
    mu, rstd = stats[0:1, :], stats[1:2, :]
    tan_mean, tan_std = stats[2:3, :], stats[3:4, :]
    can_mean, can_std = stats[4:5, :], stats[5:6, :]

    x_norm = (x - mu) * rstd                     # InstanceNorm(src), this tile
    feat_t = x_norm * tan_std + tan_mean         # TAN branch output
    feat_c = x_norm * can_std + can_mean         # CAN branch output
    out = jnp.dot(feat_t, w1_ref[...], preferred_element_type=jnp.float32)
    out = out + jnp.dot(feat_c, w2_ref[...], preferred_element_type=jnp.float32)
    out_ref[0] = (out + bias_ref[...]).astype(out_ref.dtype)


def _choose_time_tile(t, max_tile=512):
    """Largest tile <= max_tile that divides t; multiple of 8 unless full."""
    if t <= max_tile:
        return t
    start = max_tile - (max_tile % 8)
    for cand in range(start, 7, -8):
        if t % cand == 0:
            return cand
    return t


def duan_forward(src, trg, params):
    """src: (B, C, Ts), trg: (B, C, Tt) float32; params: dict of DuAN weights."""
    B, C, Ts = src.shape
    Tt = trg.shape[-1]

    # Time-major layout so channels sit on the lane axis (layout plumbing only).
    src_tc = jnp.transpose(src, (0, 2, 1)).astype(jnp.float32)   # (B, Ts, C)
    trg_tc = jnp.transpose(trg, (0, 2, 1)).astype(jnp.float32)   # (B, Tt, C)

    # Pre-transpose linear / conv weights so the kernels compute `feat @ w`.
    wq_t, wk_t, wv_t = params["tan_wq"].T, params["tan_wk"].T, params["tan_wv"].T
    wq_c, wk_c, wv_c = params["can_wq"].T, params["can_wk"].T, params["can_wv"].T
    w_conv = params["conv_w"][:, :, 0]            # (C_out, 2C)
    w1 = w_conv[:, :C].T                          # TAN half  (C_in, C_out)
    w2 = w_conv[:, C:].T                          # CAN half  (C_in, C_out)
    bias_row = params["conv_b"].reshape(1, C)

    # Kernel 1: per-batch attention work -> six per-channel stats vectors.
    stats = pl.pallas_call(
        _duan_stats_kernel,
        out_shape=jax.ShapeDtypeStruct((B, 8, C), jnp.float32),
        grid_spec=pltpu.PrefetchScalarGridSpec(
            num_scalar_prefetch=0,
            grid=(B,),
            in_specs=[
                pl.BlockSpec((1, Ts, C), lambda b: (b, 0, 0)),   # src (time-major)
                pl.BlockSpec((1, Tt, C), lambda b: (b, 0, 0)),   # trg (time-major)
                pl.BlockSpec((C, C), lambda b: (0, 0)),          # TAN w_q^T
                pl.BlockSpec((C, C), lambda b: (0, 0)),          # TAN w_k^T
                pl.BlockSpec((C, C), lambda b: (0, 0)),          # TAN w_v^T
                pl.BlockSpec((C, C), lambda b: (0, 0)),          # CAN w_q^T
                pl.BlockSpec((C, C), lambda b: (0, 0)),          # CAN w_k^T
                pl.BlockSpec((C, C), lambda b: (0, 0)),          # CAN w_v^T
            ],
            out_specs=pl.BlockSpec((1, 8, C), lambda b: (b, 0, 0)),
        ),
        compiler_params=pltpu.CompilerParams(
            dimension_semantics=("parallel",),
            vmem_limit_bytes=32 * 1024 * 1024),
    )(src_tc, trg_tc, wq_t, wk_t, wv_t, wq_c, wk_c, wv_c)

    # Kernel 2: streaming apply + fused 1x1 conv, tiled over (batch, time).
    t_tile = _choose_time_tile(Ts)
    out_tc = pl.pallas_call(
        _duan_apply_kernel,
        out_shape=jax.ShapeDtypeStruct((B, Ts, C), src.dtype),
        grid_spec=pltpu.PrefetchScalarGridSpec(
            num_scalar_prefetch=0,
            grid=(B, Ts // t_tile),
            in_specs=[
                pl.BlockSpec((1, t_tile, C), lambda b, t: (b, t, 0)),  # src tile
                pl.BlockSpec((1, 8, C), lambda b, t: (b, 0, 0)),       # stats
                pl.BlockSpec((C, C), lambda b, t: (0, 0)),             # conv W1^T
                pl.BlockSpec((C, C), lambda b, t: (0, 0)),             # conv W2^T
                pl.BlockSpec((1, C), lambda b, t: (0, 0)),             # conv bias
            ],
            out_specs=pl.BlockSpec((1, t_tile, C), lambda b, t: (b, t, 0)),
        ),
        compiler_params=pltpu.CompilerParams(
            dimension_semantics=("parallel", "parallel"),
            vmem_limit_bytes=32 * 1024 * 1024),
    )(src_tc, stats, w1, w2, bias_row)

    return jnp.transpose(out_tc, (0, 2, 1))      # back to (B, C, Ts)


# ----------------------------- pure-JAX reference ----------------------------
def _inorm(x):
    mu = jnp.mean(x, axis=-1, keepdims=True)
    var = jnp.var(x, axis=-1, keepdims=True, ddof=1)
    return (x - mu) / jnp.sqrt(var + EPS)


def _tinorm(x):
    mu = jnp.mean(x, axis=1, keepdims=True)
    var = jnp.var(x, axis=1, keepdims=True, ddof=1)
    return (x - mu) / jnp.sqrt(var + EPS)


def _adaptive_norm_reference(src, trg, norm_qk, wq, wk, wv):
    hp = jax.lax.Precision.HIGHEST
    C = src.shape[1]
    src_q = jnp.einsum("bct,oc->bto", norm_qk(src), wq, precision=hp)
    trg_k = jnp.einsum("bct,oc->bto", norm_qk(trg), wk, precision=hp)
    trg_v = jnp.einsum("bct,oc->bto", trg, wv, precision=hp)
    attn = jax.nn.softmax(
        jnp.einsum("bqc,bkc->bqk", src_q / (C ** 0.5), trg_k, precision=hp),
        axis=-1)
    mean = jnp.einsum("bqk,bkc->bqc", attn, trg_v, precision=hp)
    var = jax.nn.relu(
        jnp.einsum("bqk,bkc->bqc", attn, trg_v ** 2, precision=hp) - mean ** 2)
    mean = jnp.mean(mean, axis=1)[:, :, None]            # (B, C, 1)
    std = jnp.sqrt(jnp.mean(var, axis=1))[:, :, None]    # (B, C, 1)
    return std * _inorm(src) + mean


def duan_reference(src, trg, p):
    hp = jax.lax.Precision.HIGHEST
    src1 = _adaptive_norm_reference(src, trg, _tinorm,
                                    p["tan_wq"], p["tan_wk"], p["tan_wv"])
    src2 = _adaptive_norm_reference(src, trg, _inorm,
                                    p["can_wq"], p["can_wk"], p["can_wv"])
    cat = jnp.concatenate([src1, src2], axis=1)          # (B, 2C, Ts)
    out = jnp.einsum("bit,oi->bot", cat, p["conv_w"][:, :, 0], precision=hp)
    return out + p["conv_b"][None, :, None]


if __name__ == "__main__":
    B, C, Ts, Tt = 2, 32, 16, 24

    key = jax.random.PRNGKey(0)
    keys = jax.random.split(key, 10)
    src = jax.random.normal(keys[0], (B, C, Ts), dtype=jnp.float32)
    trg = jax.random.normal(keys[1], (B, C, Tt), dtype=jnp.float32)

    lin_bound = 1.0 / (C ** 0.5)
    conv_bound = 1.0 / ((2 * C) ** 0.5)

    def uni(k, shape, bound):
        return jax.random.uniform(k, shape, jnp.float32, -bound, bound)

    params = {
        "tan_wq": uni(keys[2], (C, C), lin_bound),
        "tan_wk": uni(keys[3], (C, C), lin_bound),
        "tan_wv": uni(keys[4], (C, C), lin_bound),
        "can_wq": uni(keys[5], (C, C), lin_bound),
        "can_wk": uni(keys[6], (C, C), lin_bound),
        "can_wv": uni(keys[7], (C, C), lin_bound),
        "conv_w": uni(keys[8], (C, 2 * C, 1), conv_bound),
        "conv_b": uni(keys[9], (C,), conv_bound),
    }

    out = duan_forward(src, trg, params)
    out = jax.block_until_ready(out)
    assert out.shape == (B, C, Ts)

    ref = duan_reference(src, trg, params)
    # Tolerance absorbs MXU-pass precision and the fused one-pass variance
    # vs. the HIGHEST-precision XLA reference; still catches structural bugs.
    assert jnp.allclose(out, ref, atol=2e-2, rtol=2e-2), (
        "mismatch vs reference: max abs err = "
        f"{float(jnp.max(jnp.abs(out - ref)))}")

    print("KERNEL_OK")
</pallas_src>

<mosaic_0001>
module attributes {stable_mosaic.version = 11 : i64} {
  func.func @_duan_stats_kernel(%arg0: i32, %arg1: memref<1x16x32xf32, #tpu.memory_space<vmem>>, %arg2: memref<1x24x32xf32, #tpu.memory_space<vmem>>, %arg3: memref<32x32xf32, #tpu.memory_space<vmem>>, %arg4: memref<32x32xf32, #tpu.memory_space<vmem>>, %arg5: memref<32x32xf32, #tpu.memory_space<vmem>>, %arg6: memref<32x32xf32, #tpu.memory_space<vmem>>, %arg7: memref<32x32xf32, #tpu.memory_space<vmem>>, %arg8: memref<32x32xf32, #tpu.memory_space<vmem>>, %arg9: memref<1x8x32xf32, #tpu.memory_space<vmem>>) attributes {dimension_semantics = [#tpu.dimension_semantics<parallel>], iteration_bounds = array<i64: 2>, scalar_prefetch = 0 : i64, scratch_operands = 0 : i64, tpu.core_type = #tpu.core_type<tc>, window_params = [{transform_indices = @transform_0, window_bounds = array<i64: 1, 16, 32>}, {transform_indices = @transform_1, window_bounds = array<i64: 1, 24, 32>}, {pipeline_mode = #tpu.pipeline_mode<synchronous>, transform_indices = @transform_2, window_bounds = array<i64: 32, 32>}, {pipeline_mode = #tpu.pipeline_mode<synchronous>, transform_indices = @transform_3, window_bounds = array<i64: 32, 32>}, {pipeline_mode = #tpu.pipeline_mode<synchronous>, transform_indices = @transform_4, window_bounds = array<i64: 32, 32>}, {pipeline_mode = #tpu.pipeline_mode<synchronous>, transform_indices = @transform_5, window_bounds = array<i64: 32, 32>}, {pipeline_mode = #tpu.pipeline_mode<synchronous>, transform_indices = @transform_6, window_bounds = array<i64: 32, 32>}, {pipeline_mode = #tpu.pipeline_mode<synchronous>, transform_indices = @transform_7, window_bounds = array<i64: 32, 32>}, {transform_indices = @transform_8, window_bounds = array<i64: 1, 8, 32>}]} {
    %c0 = arith.constant 0 : index
    %c0_0 = arith.constant 0 : index
    %c0_1 = arith.constant 0 : index
    %0 = vector.load %arg1[%c0, %c0_0, %c0_1] : memref<1x16x32xf32, #tpu.memory_space<vmem>>, vector<1x16x32xf32>
    %1 = vector.shape_cast %0 : vector<1x16x32xf32> to vector<16x32xf32>
    %c0_2 = arith.constant 0 : index
    %c0_3 = arith.constant 0 : index
    %c0_4 = arith.constant 0 : index
    %2 = vector.load %arg2[%c0_2, %c0_3, %c0_4] : memref<1x24x32xf32, #tpu.memory_space<vmem>>, vector<1x24x32xf32>
    %3 = vector.shape_cast %2 : vector<1x24x32xf32> to vector<24x32xf32>
    %cst = arith.constant dense<0.000000e+00> : vector<32xf32>
    %4 = vector.multi_reduction <add>, %1, %cst [0] : vector<16x32xf32> to vector<32xf32>
    %5 = vector.shape_cast %4 : vector<32xf32> to vector<1x32xf32>
    %6 = arith.mulf %1, %1 : vector<16x32xf32>
    %cst_5 = arith.constant dense<0.000000e+00> : vector<32xf32>
    %7 = vector.multi_reduction <add>, %6, %cst_5 [0] : vector<16x32xf32> to vector<32xf32>
    %8 = vector.shape_cast %7 : vector<32xf32> to vector<1x32xf32>
    %cst_6 = arith.constant 6.250000e-02 : f32
    %9 = vector.broadcast %cst_6 : f32 to vector<1x32xf32>
    %10 = arith.mulf %5, %9 : vector<1x32xf32>
    %cst_7 = arith.constant 1.600000e+01 : f32
    %11 = vector.broadcast %cst_7 : f32 to vector<1x32xf32>
    %12 = arith.mulf %11, %10 : vector<1x32xf32>
    %13 = arith.mulf %12, %10 : vector<1x32xf32>
    %14 = arith.subf %8, %13 : vector<1x32xf32>
    %cst_8 = arith.constant 0.0666666701 : f32
    %15 = vector.broadcast %cst_8 : f32 to vector<1x32xf32>
    %16 = arith.mulf %14, %15 : vector<1x32xf32>
    %cst_9 = arith.constant 0.000000e+00 : f32
    %17 = vector.broadcast %cst_9 : f32 to vector<1x32xf32>
    %18 = arith.maximumf %16, %17 : vector<1x32xf32>
    %cst_10 = arith.constant 9.99999974E-6 : f32
    %19 = vector.broadcast %cst_10 : f32 to vector<1x32xf32>
    %20 = arith.addf %18, %19 : vector<1x32xf32>
    %21 = math.rsqrt %20 : vector<1x32xf32>
    %22 = vector.broadcast %10 : vector<1x32xf32> to vector<16x32xf32>
    %23 = arith.subf %1, %22 : vector<16x32xf32>
    %24 = vector.broadcast %21 : vector<1x32xf32> to vector<16x32xf32>
    %25 = arith.mulf %23, %24 : vector<16x32xf32>
    %cst_11 = arith.constant dense<0.000000e+00> : vector<32xf32>
    %26 = vector.multi_reduction <add>, %3, %cst_11 [0] : vector<24x32xf32> to vector<32xf32>
    %27 = vector.shape_cast %26 : vector<32xf32> to vector<1x32xf32>
    %28 = arith.mulf %3, %3 : vector<24x32xf32>
    %cst_12 = arith.constant dense<0.000000e+00> : vector<32xf32>
    %29 = vector.multi_reduction <add>, %28, %cst_12 [0] : vector<24x32xf32> to vector<32xf32>
    %30 = vector.shape_cast %29 : vector<32xf32> to vector<1x32xf32>
    %cst_13 = arith.constant 0.0416666679 : f32
    %31 = vector.broadcast %cst_13 : f32 to vector<1x32xf32>
    %32 = arith.mulf %27, %31 : vector<1x32xf32>
    %cst_14 = arith.constant 2.400000e+01 : f32
    %33 = vector.broadcast %cst_14 : f32 to vector<1x32xf32>
    %34 = arith.mulf %33, %32 : vector<1x32xf32>
    %35 = arith.mulf %34, %32 : vector<1x32xf32>
    %36 = arith.subf %30, %35 : vector<1x32xf32>
    %cst_15 = arith.constant 0.0434782617 : f32
    %37 = vector.broadcast %cst_15 : f32 to vector<1x32xf32>
    %38 = arith.mulf %36, %37 : vector<1x32xf32>
    %cst_16 = arith.constant 0.000000e+00 : f32
    %39 = vector.broadcast %cst_16 : f32 to vector<1x32xf32>
    %40 = arith.maximumf %38, %39 : vector<1x32xf32>
    %41 = vector.broadcast %32 : vector<1x32xf32> to vector<24x32xf32>
    %42 = arith.subf %3, %41 : vector<24x32xf32>
    %cst_17 = arith.constant 9.99999974E-6 : f32
    %43 = vector.broadcast %cst_17 : f32 to vector<1x32xf32>
    %44 = arith.addf %40, %43 : vector<1x32xf32>
    %45 = math.rsqrt %44 : vector<1x32xf32>
    %46 = vector.broadcast %45 : vector<1x32xf32> to vector<24x32xf32>
    %47 = arith.mulf %42, %46 : vector<24x32xf32>
    %cst_18 = arith.constant dense<0.000000e+00> : vector<16xf32>
    %48 = vector.multi_reduction <add>, %1, %cst_18 [1] : vector<16x32xf32> to vector<16xf32>
    %49 = vector.shape_cast %48 : vector<16xf32> to vector<16x1xf32>
    %50 = arith.mulf %1, %1 : vector<16x32xf32>
    %cst_19 = arith.constant dense<0.000000e+00> : vector<16xf32>
    %51 = vector.multi_reduction <add>, %50, %cst_19 [1] : vector<16x32xf32> to vector<16xf32>
    %52 = vector.shape_cast %51 : vector<16xf32> to vector<16x1xf32>
    %cst_20 = arith.constant 3.125000e-02 : f32
    %53 = vector.broadcast %cst_20 : f32 to vector<16x1xf32>
    %54 = arith.mulf %49, %53 : vector<16x1xf32>
    %cst_21 = arith.constant 3.200000e+01 : f32
    %55 = vector.broadcast %cst_21 : f32 to vector<16x1xf32>
    %56 = arith.mulf %55, %54 : vector<16x1xf32>
    %57 = arith.mulf %56, %54 : vector<16x1xf32>
    %58 = arith.subf %52, %57 : vector<16x1xf32>
    %cst_22 = arith.constant 0.0322580636 : f32
    %59 = vector.broadcast %cst_22 : f32 to vector<16x1xf32>
    %60 = arith.mulf %58, %59 : vector<16x1xf32>
    %cst_23 = arith.constant 0.000000e+00 : f32
    %61 = vector.broadcast %cst_23 : f32 to vector<16x1xf32>
    %62 = arith.maximumf %60, %61 : vector<16x1xf32>
    %63 = vector.broadcast %54 : vector<16x1xf32> to vector<16x32xf32>
    %64 = arith.subf %1, %63 : vector<16x32xf32>
    %cst_24 = arith.constant 9.99999974E-6 : f32
    %65 = vector.broadcast %cst_24 : f32 to vector<16x1xf32>
    %66 = arith.addf %62, %65 : vector<16x1xf32>
    %67 = math.rsqrt %66 : vector<16x1xf32>
    %68 = vector.broadcast %67 : vector<16x1xf32> to vector<16x32xf32>
    %69 = arith.mulf %64, %68 : vector<16x32xf32>
    %cst_25 = arith.constant dense<0.000000e+00> : vector<24xf32>
    %70 = vector.multi_reduction <add>, %3, %cst_25 [1] : vector<24x32xf32> to vector<24xf32>
    %71 = vector.shape_cast %70 : vector<24xf32> to vector<24x1xf32>
    %72 = arith.mulf %3, %3 : vector<24x32xf32>
    %cst_26 = arith.constant dense<0.000000e+00> : vector<24xf32>
    %73 = vector.multi_reduction <add>, %72, %cst_26 [1] : vector<24x32xf32> to vector<24xf32>
    %74 = vector.shape_cast %73 : vector<24xf32> to vector<24x1xf32>
    %cst_27 = arith.constant 3.125000e-02 : f32
    %75 = vector.broadcast %cst_27 : f32 to vector<24x1xf32>
    %76 = arith.mulf %71, %75 : vector<24x1xf32>
    %cst_28 = arith.constant 3.200000e+01 : f32
    %77 = vector.broadcast %cst_28 : f32 to vector<24x1xf32>
    %78 = arith.mulf %77, %76 : vector<24x1xf32>
    %79 = arith.mulf %78, %76 : vector<24x1xf32>
    %80 = arith.subf %74, %79 : vector<24x1xf32>
    %cst_29 = arith.constant 0.0322580636 : f32
    %81 = vector.broadcast %cst_29 : f32 to vector<24x1xf32>
    %82 = arith.mulf %80, %81 : vector<24x1xf32>
    %cst_30 = arith.constant 0.000000e+00 : f32
    %83 = vector.broadcast %cst_30 : f32 to vector<24x1xf32>
    %84 = arith.maximumf %82, %83 : vector<24x1xf32>
    %85 = vector.broadcast %76 : vector<24x1xf32> to vector<24x32xf32>
    %86 = arith.subf %3, %85 : vector<24x32xf32>
    %cst_31 = arith.constant 9.99999974E-6 : f32
    %87 = vector.broadcast %cst_31 : f32 to vector<24x1xf32>
    %88 = arith.addf %84, %87 : vector<24x1xf32>
    %89 = math.rsqrt %88 : vector<24x1xf32>
    %90 = vector.broadcast %89 : vector<24x1xf32> to vector<24x32xf32>
    %91 = arith.mulf %86, %90 : vector<24x32xf32>
    %c0_32 = arith.constant 0 : index
    %c0_33 = arith.constant 0 : index
    %92 = vector.load %arg3[%c0_32, %c0_33] : memref<32x32xf32, #tpu.memory_space<vmem>>, vector<32x32xf32>
    %c0_34 = arith.constant 0 : index
    %c0_35 = arith.constant 0 : index
    %93 = vector.load %arg4[%c0_34, %c0_35] : memref<32x32xf32, #tpu.memory_space<vmem>>, vector<32x32xf32>
    %c0_36 = arith.constant 0 : index
    %c0_37 = arith.constant 0 : index
    %94 = vector.load %arg5[%c0_36, %c0_37] : memref<32x32xf32, #tpu.memory_space<vmem>>, vector<32x32xf32>
    %cst_38 = arith.constant dense<0.000000e+00> : vector<16x32xf32>
    %95 = tpu.matmul %69, %92, %cst_38 {dimension_numbers = #tpu.dot_dimension_numbers<[1], [0], [0], [1], [0, 0, 1, 1], [], []>} : vector<16x32xf32>, vector<32x32xf32>, vector<16x32xf32> -> vector<16x32xf32>
    %cst_39 = arith.constant 0.176776692 : f32
    %96 = vector.broadcast %cst_39 : f32 to vector<16x32xf32>
    %97 = arith.mulf %95, %96 : vector<16x32xf32>
    %cst_40 = arith.constant dense<0.000000e+00> : vector<24x32xf32>
    %98 = tpu.matmul %91, %93, %cst_40 {dimension_numbers = #tpu.dot_dimension_numbers<[1], [0], [0], [1], [0, 0, 1, 1], [], []>} : vector<24x32xf32>, vector<32x32xf32>, vector<24x32xf32> -> vector<24x32xf32>
    %cst_41 = arith.constant dense<0.000000e+00> : vector<24x32xf32>
    %99 = tpu.matmul %3, %94, %cst_41 {dimension_numbers = #tpu.dot_dimension_numbers<[1], [0], [0], [1], [0, 0, 1, 1], [], []>} : vector<24x32xf32>, vector<32x32xf32>, vector<24x32xf32> -> vector<24x32xf32>
    %cst_42 = arith.constant dense<0.000000e+00> : vector<16x24xf32>
    %100 = tpu.matmul %97, %98, %cst_42 {dimension_numbers = #tpu.dot_dimension_numbers<[1], [1], [0], [0], [0, 0, 1, 0], [], []>} : vector<16x32xf32>, vector<24x32xf32>, vector<16x24xf32> -> vector<16x24xf32>
    %cst_43 = arith.constant dense<0xFF800000> : vector<16xf32>
    %101 = vector.multi_reduction <maximumf>, %100, %cst_43 [1] : vector<16x24xf32> to vector<16xf32>
    %102 = vector.shape_cast %101 : vector<16xf32> to vector<16x1xf32>
    %103 = vector.broadcast %102 : vector<16x1xf32> to vector<16x24xf32>
    %104 = arith.subf %100, %103 : vector<16x24xf32>
    %105 = math.exp %104 : vector<16x24xf32>
    %cst_44 = arith.constant dense<0.000000e+00> : vector<16xf32>
    %106 = vector.multi_reduction <add>, %105, %cst_44 [1] : vector<16x24xf32> to vector<16xf32>
    %107 = vector.shape_cast %106 : vector<16xf32> to vector<16x1xf32>
    %108 = vector.broadcast %107 : vector<16x1xf32> to vector<16x24xf32>
    %109 = arith.divf %105, %108 : vector<16x24xf32>
    %cst_45 = arith.constant dense<0.000000e+00> : vector<16x32xf32>
    %110 = tpu.matmul %109, %99, %cst_45 {dimension_numbers = #tpu.dot_dimension_numbers<[1], [0], [0], [1], [0, 0, 1, 1], [], []>} : vector<16x24xf32>, vector<24x32xf32>, vector<16x32xf32> -> vector<16x32xf32>
    %111 = arith.mulf %99, %99 : vector<24x32xf32>
    %cst_46 = arith.constant dense<0.000000e+00> : vector<16x32xf32>
    %112 = tpu.matmul %109, %111, %cst_46 {dimension_numbers = #tpu.dot_dimension_numbers<[1], [0], [0], [1], [0, 0, 1, 1], [], []>} : vector<16x24xf32>, vector<24x32xf32>, vector<16x32xf32> -> vector<16x32xf32>
    %113 = arith.mulf %110, %110 : vector<16x32xf32>
    %114 = arith.subf %112, %113 : vector<16x32xf32>
    %cst_47 = arith.constant 0.000000e+00 : f32
    %115 = vector.broadcast %cst_47 : f32 to vector<16x32xf32>
    %116 = arith.maximumf %114, %115 : vector<16x32xf32>
    %cst_48 = arith.constant dense<0.000000e+00> : vector<32xf32>
    %117 = vector.multi_reduction <add>, %110, %cst_48 [0] : vector<16x32xf32> to vector<32xf32>
    %118 = vector.shape_cast %117 : vector<32xf32> to vector<1x32xf32>
    %cst_49 = arith.constant 1.600000e+01 : f32
    %119 = vector.broadcast %cst_49 : f32 to vector<1x32xf32>
    %120 = arith.divf %118, %119 : vector<1x32xf32>
    %cst_50 = arith.constant dense<0.000000e+00> : vector<32xf32>
    %121 = vector.multi_reduction <add>, %116, %cst_50 [0] : vector<16x32xf32> to vector<32xf32>
    %122 = vector.shape_cast %121 : vector<32xf32> to vector<1x32xf32>
    %cst_51 = arith.constant 1.600000e+01 : f32
    %123 = vector.broadcast %cst_51 : f32 to vector<1x32xf32>
    %124 = arith.divf %122, %123 : vector<1x32xf32>
    %125 = math.sqrt %124 : vector<1x32xf32>
    %c0_52 = arith.constant 0 : index
    %c0_53 = arith.constant 0 : index
    %126 = vector.load %arg6[%c0_52, %c0_53] : memref<32x32xf32, #tpu.memory_space<vmem>>, vector<32x32xf32>
    %c0_54 = arith.constant 0 : index
    %c0_55 = arith.constant 0 : index
    %127 = vector.load %arg7[%c0_54, %c0_55] : memref<32x32xf32, #tpu.memory_space<vmem>>, vector<32x32xf32>
    %c0_56 = arith.constant 0 : index
    %c0_57 = arith.constant 0 : index
    %128 = vector.load %arg8[%c0_56, %c0_57] : memref<32x32xf32, #tpu.memory_space<vmem>>, vector<32x32xf32>
    %cst_58 = arith.constant dense<0.000000e+00> : vector<16x32xf32>
    %129 = tpu.matmul %25, %126, %cst_58 {dimension_numbers = #tpu.dot_dimension_numbers<[1], [0], [0], [1], [0, 0, 1, 1], [], []>} : vector<16x32xf32>, vector<32x32xf32>, vector<16x32xf32> -> vector<16x32xf32>
    %cst_59 = arith.constant 0.176776692 : f32
    %130 = vector.broadcast %cst_59 : f32 to vector<16x32xf32>
    %131 = arith.mulf %129, %130 : vector<16x32xf32>
    %cst_60 = arith.constant dense<0.000000e+00> : vector<24x32xf32>
    %132 = tpu.matmul %47, %127, %cst_60 {dimension_numbers = #tpu.dot_dimension_numbers<[1], [0], [0], [1], [0, 0, 1, 1], [], []>} : vector<24x32xf32>, vector<32x32xf32>, vector<24x32xf32> -> vector<24x32xf32>
    %cst_61 = arith.constant dense<0.000000e+00> : vector<24x32xf32>
    %133 = tpu.matmul %3, %128, %cst_61 {dimension_numbers = #tpu.dot_dimension_numbers<[1], [0], [0], [1], [0, 0, 1, 1], [], []>} : vector<24x32xf32>, vector<32x32xf32>, vector<24x32xf32> -> vector<24x32xf32>
    %cst_62 = arith.constant dense<0.000000e+00> : vector<16x24xf32>
    %134 = tpu.matmul %131, %132, %cst_62 {dimension_numbers = #tpu.dot_dimension_numbers<[1], [1], [0], [0], [0, 0, 1, 0], [], []>} : vector<16x32xf32>, vector<24x32xf32>, vector<16x24xf32> -> vector<16x24xf32>
    %cst_63 = arith.constant dense<0xFF800000> : vector<16xf32>
    %135 = vector.multi_reduction <maximumf>, %134, %cst_63 [1] : vector<16x24xf32> to vector<16xf32>
    %136 = vector.shape_cast %135 : vector<16xf32> to vector<16x1xf32>
    %137 = vector.broadcast %136 : vector<16x1xf32> to vector<16x24xf32>
    %138 = arith.subf %134, %137 : vector<16x24xf32>
    %139 = math.exp %138 : vector<16x24xf32>
    %cst_64 = arith.constant dense<0.000000e+00> : vector<16xf32>
    %140 = vector.multi_reduction <add>, %139, %cst_64 [1] : vector<16x24xf32> to vector<16xf32>
    %141 = vector.shape_cast %140 : vector<16xf32> to vector<16x1xf32>
    %142 = vector.broadcast %141 : vector<16x1xf32> to vector<16x24xf32>
    %143 = arith.divf %139, %142 : vector<16x24xf32>
    %cst_65 = arith.constant dense<0.000000e+00> : vector<16x32xf32>
    %144 = tpu.matmul %143, %133, %cst_65 {dimension_numbers = #tpu.dot_dimension_numbers<[1], [0], [0], [1], [0, 0, 1, 1], [], []>} : vector<16x24xf32>, vector<24x32xf32>, vector<16x32xf32> -> vector<16x32xf32>
    %145 = arith.mulf %133, %133 : vector<24x32xf32>
    %cst_66 = arith.constant dense<0.000000e+00> : vector<16x32xf32>
    %146 = tpu.matmul %143, %145, %cst_66 {dimension_numbers = #tpu.dot_dimension_numbers<[1], [0], [0], [1], [0, 0, 1, 1], [], []>} : vector<16x24xf32>, vector<24x32xf32>, vector<16x32xf32> -> vector<16x32xf32>
    %147 = arith.mulf %144, %144 : vector<16x32xf32>
    %148 = arith.subf %146, %147 : vector<16x32xf32>
    %cst_67 = arith.constant 0.000000e+00 : f32
    %149 = vector.broadcast %cst_67 : f32 to vector<16x32xf32>
    %150 = arith.maximumf %148, %149 : vector<16x32xf32>
    %cst_68 = arith.constant dense<0.000000e+00> : vector<32xf32>
    %151 = vector.multi_reduction <add>, %144, %cst_68 [0] : vector<16x32xf32> to vector<32xf32>
    %152 = vector.shape_cast %151 : vector<32xf32> to vector<1x32xf32>
    %cst_69 = arith.constant 1.600000e+01 : f32
    %153 = vector.broadcast %cst_69 : f32 to vector<1x32xf32>
    %154 = arith.divf %152, %153 : vector<1x32xf32>
    %cst_70 = arith.constant dense<0.000000e+00> : vector<32xf32>
    %155 = vector.multi_reduction <add>, %150, %cst_70 [0] : vector<16x32xf32> to vector<32xf32>
    %156 = vector.shape_cast %155 : vector<32xf32> to vector<1x32xf32>
    %cst_71 = arith.constant 1.600000e+01 : f32
    %157 = vector.broadcast %cst_71 : f32 to vector<1x32xf32>
    %158 = arith.divf %156, %157 : vector<1x32xf32>
    %159 = math.sqrt %158 : vector<1x32xf32>
    %c0_72 = arith.constant 0 : index
    %c0_73 = arith.constant 0 : index
    %c0_74 = arith.constant 0 : index
    %160 = vector.load %arg9[%c0_72, %c0_73, %c0_74] : memref<1x8x32xf32, #tpu.memory_space<vmem>>, vector<1x1x32xf32>
    %161 = vector.shape_cast %160 : vector<1x1x32xf32> to vector<1x32xf32>
    %162 = vector.shape_cast %10 : vector<1x32xf32> to vector<1x1x32xf32>
    tpu.vector_store %arg9[%c0_72, %c0_73, %c0_74], %162 {strides = array<i32>} : memref<1x8x32xf32, #tpu.memory_space<vmem>>, vector<1x1x32xf32>,
    %c0_75 = arith.constant 0 : index
    %c1 = arith.constant 1 : index
    %c0_76 = arith.constant 0 : index
    %163 = vector.load %arg9[%c0_75, %c1, %c0_76] : memref<1x8x32xf32, #tpu.memory_space<vmem>>, vector<1x1x32xf32>
    %164 = vector.shape_cast %163 : vector<1x1x32xf32> to vector<1x32xf32>
    %165 = vector.shape_cast %21 : vector<1x32xf32> to vector<1x1x32xf32>
    tpu.vector_store %arg9[%c0_75, %c1, %c0_76], %165 {strides = array<i32>} : memref<1x8x32xf32, #tpu.memory_space<vmem>>, vector<1x1x32xf32>,
    %c0_77 = arith.constant 0 : index
    %c2 = arith.constant 2 : index
    %c0_78 = arith.constant 0 : index
    %166 = vector.load %arg9[%c0_77, %c2, %c0_78] : memref<1x8x32xf32, #tpu.memory_space<vmem>>, vector<1x1x32xf32>
    %167 = vector.shape_cast %166 : vector<1x1x32xf32> to vector<1x32xf32>
    %168 = vector.shape_cast %120 : vector<1x32xf32> to vector<1x1x32xf32>
    tpu.vector_store %arg9[%c0_77, %c2, %c0_78], %168 {strides = array<i32>} : memref<1x8x32xf32, #tpu.memory_space<vmem>>, vector<1x1x32xf32>,
    %c0_79 = arith.constant 0 : index
    %c3 = arith.constant 3 : index
    %c0_80 = arith.constant 0 : index
    %169 = vector.load %arg9[%c0_79, %c3, %c0_80] : memref<1x8x32xf32, #tpu.memory_space<vmem>>, vector<1x1x32xf32>
    %170 = vector.shape_cast %169 : vector<1x1x32xf32> to vector<1x32xf32>
    %171 = vector.shape_cast %125 : vector<1x32xf32> to vector<1x1x32xf32>
    tpu.vector_store %arg9[%c0_79, %c3, %c0_80], %171 {strides = array<i32>} : memref<1x8x32xf32, #tpu.memory_space<vmem>>, vector<1x1x32xf32>,
    %c0_81 = arith.constant 0 : index
    %c4 = arith.constant 4 : index
    %c0_82 = arith.constant 0 : index
    %172 = vector.load %arg9[%c0_81, %c4, %c0_82] : memref<1x8x32xf32, #tpu.memory_space<vmem>>, vector<1x1x32xf32>
    %173 = vector.shape_cast %172 : vector<1x1x32xf32> to vector<1x32xf32>
    %174 = vector.shape_cast %154 : vector<1x32xf32> to vector<1x1x32xf32>
    tpu.vector_store %arg9[%c0_81, %c4, %c0_82], %174 {strides = array<i32>} : memref<1x8x32xf32, #tpu.memory_space<vmem>>, vector<1x1x32xf32>,
    %c0_83 = arith.constant 0 : index
    %c5 = arith.constant 5 : index
    %c0_84 = arith.constant 0 : index
    %175 = vector.load %arg9[%c0_83, %c5, %c0_84] : memref<1x8x32xf32, #tpu.memory_space<vmem>>, vector<1x1x32xf32>
    %176 = vector.shape_cast %175 : vector<1x1x32xf32> to vector<1x32xf32>
    %177 = vector.shape_cast %159 : vector<1x32xf32> to vector<1x1x32xf32>
    tpu.vector_store %arg9[%c0_83, %c5, %c0_84], %177 {strides = array<i32>} : memref<1x8x32xf32, #tpu.memory_space<vmem>>, vector<1x1x32xf32>,
    %cst_85 = arith.constant 0.000000e+00 : f32
    %178 = vector.broadcast %cst_85 : f32 to vector<2x32xf32>
    %c0_86 = arith.constant 0 : index
    %c6 = arith.constant 6 : index
    %c0_87 = arith.constant 0 : index
    %179 = vector.load %arg9[%c0_86, %c6, %c0_87] : memref<1x8x32xf32, #tpu.memory_space<vmem>>, vector<1x2x32xf32>
    %180 = vector.shape_cast %179 : vector<1x2x32xf32> to vector<2x32xf32>
    %181 = vector.shape_cast %178 : vector<2x32xf32> to vector<1x2x32xf32>
    tpu.vector_store %arg9[%c0_86, %c6, %c0_87], %181 {strides = array<i32>} : memref<1x8x32xf32, #tpu.memory_space<vmem>>, vector<1x2x32xf32>,
    return
  }
  func.func @transform_0(%arg0: i32) -> (i32, i32, i32) {
    %c0_i32 = arith.constant 0 : i32
    %c0_i32_0 = arith.constant 0 : i32
    %c0_i32_1 = arith.constant 0 : i32
    return %arg0, %c0_i32, %c0_i32_0 : i32, i32, i32
  }
  func.func @transform_1(%arg0: i32) -> (i32, i32, i32) {
    %c0_i32 = arith.constant 0 : i32
    %c0_i32_0 = arith.constant 0 : i32
    %c0_i32_1 = arith.constant 0 : i32
    return %arg0, %c0_i32, %c0_i32_0 : i32, i32, i32
  }
  func.func @transform_2(%arg0: i32) -> (i32, i32) {
    %c0_i32 = arith.constant 0 : i32
    %c0_i32_0 = arith.constant 0 : i32
    %c0_i32_1 = arith.constant 0 : i32
    return %c0_i32, %c0_i32_0 : i32, i32
  }
  func.func @transform_3(%arg0: i32) -> (i32, i32) {
    %c0_i32 = arith.constant 0 : i32
    %c0_i32_0 = arith.constant 0 : i32
    %c0_i32_1 = arith.constant 0 : i32
    return %c0_i32, %c0_i32_0 : i32, i32
  }
  func.func @transform_4(%arg0: i32) -> (i32, i32) {
    %c0_i32 = arith.constant 0 : i32
    %c0_i32_0 = arith.constant 0 : i32
    %c0_i32_1 = arith.constant 0 : i32
    return %c0_i32, %c0_i32_0 : i32, i32
  }
  func.func @transform_5(%arg0: i32) -> (i32, i32) {
    %c0_i32 = arith.constant 0 : i32
    %c0_i32_0 = arith.constant 0 : i32
    %c0_i32_1 = arith.constant 0 : i32
    return %c0_i32, %c0_i32_0 : i32, i32
  }
  func.func @transform_6(%arg0: i32) -> (i32, i32) {
    %c0_i32 = arith.constant 0 : i32
    %c0_i32_0 = arith.constant 0 : i32
    %c0_i32_1 = arith.constant 0 : i32
    return %c0_i32, %c0_i32_0 : i32, i32
  }
  func.func @transform_7(%arg0: i32) -> (i32, i32) {
    %c0_i32 = arith.constant 0 : i32
    %c0_i32_0 = arith.constant 0 : i32
    %c0_i32_1 = arith.constant 0 : i32
    return %c0_i32, %c0_i32_0 : i32, i32
  }
  func.func @transform_8(%arg0: i32) -> (i32, i32, i32) {
    %c0_i32 = arith.constant 0 : i32
    %c0_i32_0 = arith.constant 0 : i32
    %c0_i32_1 = arith.constant 0 : i32
    return %arg0, %c0_i32, %c0_i32_0 : i32, i32, i32
  }
}

</mosaic_0001>

<bundles_post_ra>
// kernel: tpu_custom_call.1
= control target key start
LH: loop header
LB: loop body
LE: loop exit
PB: predicated region body
PF: predicated region fallthrough
CT: control target
= control target key end

     0   :  { %s3381_s0 = inlined_call_operand.hbm [shape: f32[2,16,32], index: 0, kind: input, shape index: {}]   ;;  %s3382_s1 = inlined_call_operand.hbm [shape: f32[2,24,32], index: 1, kind: input, shape index: {}]   ;;  %s3383_s2 = inlined_call_operand.hbm [shape: f32[32,32], index: 2, kind: input, shape index: {}]   ;;  %s3384_s3 = inlined_call_operand.hbm [shape: f32[32,32], index: 3, kind: input, shape index: {}]   ;;  %s3385_s4 = inlined_call_operand.hbm [shape: f32[32,32], index: 4, kind: input, shape index: {}]   ;;  %s3386_s5 = inlined_call_operand.hbm [shape: f32[32,32], index: 5, kind: input, shape index: {}]   ;;  %s3387_s6 = inlined_call_operand.hbm [shape: f32[32,32], index: 6, kind: input, shape index: {}]   ;;  %s3388_s7 = inlined_call_operand.hbm [shape: f32[32,32], index: 7, kind: input, shape index: {}]   ;;  %s3389_s8 = inlined_call_operand.hbm [shape: f32[2,8,32], index: 8, kind: output, shape index: {}]  }
   0x1   :  { %3397 = sst [smem:[#allocation24_spill]] %s3381_s0 }
   0x2   :  { %3398 = sst [smem:[#allocation25_spill]] %s3383_s2 }
   0x3   :  { %3399 = sst [smem:[#allocation26_spill]] %s3384_s3 }
   0x4   :  { %3400 = sst [smem:[#allocation27_spill]] %s3385_s4 }
   0x5   :  { %3401 = sst [smem:[#allocation28_spill]] %s3386_s5 }
   0x6   :  { %3402 = sst [smem:[#allocation29_spill]] %s3387_s6 }
   0x7   :  { %13 = vsyncpa [#allocation3], 0 }
   0x8   :  { %15 = vsyncpa [#allocation3 + $0x1], 0 }
   0x9   :  { %16 = vsyncpa [#allocation6], 0 }
   0xa   :  { %18 = vsyncpa [#allocation6 + $0x1], 0 }
   0xb   :  { %19 = vsyncpa [#allocation9], 0 }
   0xc   :  { %20 = vsyncpa [#allocation12], 0 }
   0xd   :  { %21 = vsyncpa [#allocation15], 0 }
   0xe   :  { %22 = vsyncpa [#allocation4], 0 }
   0xf   :  { %24 = vsyncpa [#allocation4 + $0x1], 0  ;;  %s2790_s27 = smov 0   ;;  %s2792_s28 = smov 0  }
  0x10   :  { %s2794_s29 = smov 0   ;;  %s2796_s30 = smov 0  }
  0x11 LB: > { %s2731_s9 = smov [#allocation7]   ;;  %s2811_s11 = sadd.s32 4294967295, %s2729_s30   ;;  %s2729_s30 = sphi %s2796_s30, %s3438_s30   ;;  %s2725_s29 = sphi %s2794_s29, %s3437_s29   ;;  %s2721_s28 = sphi %s2792_s28, %s3436_s28   ;;  %s2717_s27 = sphi %s2790_s27, %s3435_s27  }
  0x12   : > { %s251_s10 = sshll.u32 %s2731_s9, 4  ;;  %p1919_p0 = scmp.ge.s32.totalorder %s2729_s30, 1  ;;  %s2816_s10 = int_to_ptr.vmem [resolvable:$true] %s251_s10 }
  0x13   : > { %p3390_p1 = scmp.eq.s32.totalorder %s2811_s11, 0  ;;  %p239_p2 = scmp.lt.s32.totalorder %s2729_s30, 3 }
  0x14   : > { %s2732_s13 = smov [#allocation8]   ;;  %s2733_s16 = smov [#allocation11]  }
  0x15   : > { %p2818_p3 = pnand %p1919_p0, %p239_p2  ;;  %s264_s14 = sshll.u32 %s2732_s13, 4  ;;  %s2831_s14 = int_to_ptr.vmem [resolvable:$true] %s264_s14 }
  0x16   : > { %s290_s17 = sshll.u32 %s2733_s16, 4  ;;  %s3405_s2 = sld [smem:[#allocation25_spill]]  ;;  %s2833_s17 = int_to_ptr.vmem [resolvable:$true] %s290_s17 }
  0x17   : > { %s3403_s12 = scalar_select %p2818_p3, 1, 0 }
  0x18   : > { %p2294_p5 = pneg %p2818_p3 }
  0x1a   : > { %p2827_p6 = pnand %p2294_p5, %p3390_p1 }
  0x1c   : > { %s2415_s20 = scalar_lea.hbm %s3405_s2, 512  ;;  %p2843_p8 = pneg %p2827_p6 }
  0x1d   : > { %p2416_p7 = scmp.ne.s32.totalorder %s3405_s2, %s2415_s20  ;;  %p2422_p11 = scmp.lt.u32.totalorder %s2415_s20, %s3405_s2 }
  0x1f   : > { %p2418_p9 = pnand %p2843_p8, %p2416_p7 }
  0x21   : > { %p2419_p10 = pneg %p2418_p9 }
  0x23   : > { %p2424_p12 = pnand %p2422_p11, %p2419_p10 }
  0x25   : > { %2427 = shalt.err (!%p2424_p12)
}
  0x26   : > { %s2428_s26 = scalar_lea.vmem %s2816_s10, 512  ;;  %p2436_p5 = scmp.lt.s32.totalorder %s2816_s10, %s2816_s10 }
  0x27   : > { %p2429_p13 = scmp.ne.s32.totalorder %s2816_s10, %s2428_s26  ;;  %p2437_p4 = scmp.lt.s32.totalorder %s2428_s26, %s2428_s26 }
  0x29   : > { %p2431_p0 = pnand %p2429_p13, %p2843_p8  ;;  %p2438_p7 = por %p2437_p4, %p2436_p5 }
  0x2b   : > { %p2432_p2 = pneg %p2431_p0 }
  0x2d   : > { %p2439_p9 = pnand %p2438_p7, %p2432_p2 }
  0x2f   : > { %2442 = shalt.err (!%p2439_p9)
}
  0x30   : > { %s3392_s9 = smov 128   ;;  %s3394_s13 = smov 8  }
  0x31   : > { %2297 = dma.hbm_to_vmem [thread:$0]  (!%p2827_p6), %s3405_s2, 512, %s2816_s10, [#allocation6], %s3392_s9, %s3392_s9, %s3394_s13  }
  0x32   : > { %s3407_s3 = sld [smem:[#allocation26_spill]] }
  0x38   : > { %s2443_s21 = scalar_lea.hbm %s3407_s3, 512 }
  0x39   : > { %p2444_p4 = scmp.ne.s32.totalorder %s3407_s3, %s2443_s21  ;;  %p2450_p12 = scmp.lt.u32.totalorder %s2443_s21, %s3407_s3 }
  0x3b   : > { %p2446_p10 = pnand %p2444_p4, %p2843_p8 }
  0x3d   : > { %p2447_p11 = pneg %p2446_p10 }
  0x3f   : > { %p2452_p13 = pnand %p2450_p12, %p2447_p11 }
  0x41   : > { %2455 = shalt.err (!%p2452_p13)
}
  0x42   : > { %s2456_s10 = scalar_lea.vmem %s2831_s14, 512  ;;  %p2464_p7 = scmp.lt.s32.totalorder %s2831_s14, %s2831_s14 }
  0x43   : > { %p2457_p0 = scmp.ne.s32.totalorder %s2831_s14, %s2456_s10  ;;  %p2465_p9 = scmp.lt.s32.totalorder %s2456_s10, %s2456_s10 }
  0x45   : > { %p2459_p2 = pnand %p2457_p0, %p2843_p8  ;;  %p2466_p4 = por %p2465_p9, %p2464_p7 }
  0x47   : > { %p2460_p5 = pneg %p2459_p2 }
  0x49   : > { %p2467_p10 = pnand %p2466_p4, %p2460_p5 }
  0x4b   : > { %2470 = shalt.err (!%p2467_p10)
}
  0x4c   : > { %2300 = dma.hbm_to_vmem [thread:$0]  (!%p2827_p6), %s3407_s3, 512, %s2831_s14, [#allocation9], %s3392_s9, %s3392_s9, %s3394_s13  }
  0x4d   : > { %s3408_s5 = sld [smem:[#allocation28_spill]] }
  0x53   : > { %s2471_s21 = scalar_lea.hbm %s3408_s5, 512 }
  0x54   : > { %p2472_p11 = scmp.ne.s32.totalorder %s3408_s5, %s2471_s21  ;;  %p2478_p0 = scmp.lt.u32.totalorder %s2471_s21, %s3408_s5 }
  0x56   : > { %p2474_p12 = pnand %p2472_p11, %p2843_p8 }
  0x58   : > { %p2475_p13 = pneg %p2474_p12 }
  0x5a   : > { %p2480_p2 = pnand %p2478_p0, %p2475_p13 }
  0x5c   : > { %2483 = shalt.err (!%p2480_p2)
}
  0x5d   : > { %s2484_s14 = scalar_lea.vmem %s2833_s17, 512  ;;  %p2492_p4 = scmp.lt.s32.totalorder %s2833_s17, %s2833_s17 }
  0x5e   : > { %p2485_p5 = scmp.ne.s32.totalorder %s2833_s17, %s2484_s14  ;;  %p2493_p10 = scmp.lt.s32.totalorder %s2484_s14, %s2484_s14 }
  0x60   : > { %p2487_p7 = pnand %p2485_p5, %p2843_p8  ;;  %p2494_p11 = por %p2493_p10, %p2492_p4 }
  0x62   : > { %p2488_p9 = pneg %p2487_p7 }
  0x64   : > { %p2495_p12 = pnand %p2494_p11, %p2488_p9 }
  0x66   : > { %2498 = shalt.err (!%p2495_p12)
}
  0x67   : > { %2306 = dma.hbm_to_vmem [thread:$0]  (!%p2827_p6), %s3408_s5, 512, %s2833_s17, [#allocation12], %s3392_s9, %s3392_s9, %s3394_s13  }
  0x68   : > { %s2736_s18 = smov [#allocation10]   ;;  %s2737_s20 = smov [#allocation13]  }
  0x69   : > { %s277_s19 = sshll.u32 %s2736_s18, 4  ;;  %s303_s21 = sshll.u32 %s2737_s20, 4  ;;  %s278_s19 = int_to_ptr.vmem [resolvable:$true] %s277_s19  ;;  %s304_s21 = int_to_ptr.vmem [resolvable:$true] %s303_s21 }
  0x6a   : > { %s3409_s4 = sld [smem:[#allocation27_spill]] }
  0x70   : > { %s2499_s25 = scalar_lea.hbm %s3409_s4, 512 }
  0x71   : > { %p2500_p13 = scmp.ne.s32.totalorder %s3409_s4, %s2499_s25  ;;  %p2506_p5 = scmp.lt.u32.totalorder %s2499_s25, %s3409_s4 }
  0x73   : > { %p2502_p0 = pnand %p2500_p13, %p2843_p8 }
  0x75   : > { %p2503_p2 = pneg %p2502_p0 }
  0x77   : > { %p2508_p7 = pnand %p2506_p5, %p2503_p2 }
  0x79   : > { %2511 = shalt.err (!%p2508_p7)
}
  0x7a   : > { %s2512_s17 = scalar_lea.vmem %s278_s19, 512  ;;  %p2520_p11 = scmp.lt.s32.totalorder %s278_s19, %s278_s19 }
  0x7b   : > { %p2513_p9 = scmp.ne.s32.totalorder %s278_s19, %s2512_s17  ;;  %p2521_p12 = scmp.lt.s32.totalorder %s2512_s17, %s2512_s17 }
  0x7d   : > { %p2515_p4 = pnand %p2513_p9, %p2843_p8  ;;  %p2522_p1 = por %p2521_p12, %p2520_p11 }
  0x7f   : > { %p2516_p10 = pneg %p2515_p4 }
  0x81   : > { %p2523_p3 = pnand %p2522_p1, %p2516_p10 }
  0x83   : > { %2526 = shalt.err (!%p2523_p3)
}
  0x84   : > { %2303 = dma.hbm_to_vmem [thread:$0]  (!%p2827_p6), %s3409_s4, 512, %s278_s19, [#allocation9], %s3392_s9, %s3392_s9, %s3394_s13  }
  0x85   : > { %s3410_s6 = sld [smem:[#allocation29_spill]] }
  0x8b   : > { %s2527_s22 = scalar_lea.hbm %s3410_s6, 512 }
  0x8c   : > { %p2528_p1 = scmp.ne.s32.totalorder %s3410_s6, %s2527_s22  ;;  %p2534_p0 = scmp.lt.u32.totalorder %s2527_s22, %s3410_s6 }
  0x8e   : > { %p2530_p3 = pnand %p2528_p1, %p2843_p8 }
  0x90   : > { %p2531_p13 = pneg %p2530_p3 }
  0x92   : > { %p2536_p2 = pnand %p2534_p0, %p2531_p13 }
  0x94   : > { %2539 = shalt.err (!%p2536_p2)
}
  0x95   : > { %s2540_s10 = scalar_lea.vmem %s304_s21, 512  ;;  %p2548_p4 = scmp.lt.s32.totalorder %s304_s21, %s304_s21 }
  0x96   : > { %p2541_p5 = scmp.ne.s32.totalorder %s304_s21, %s2540_s10  ;;  %p2549_p10 = scmp.lt.s32.totalorder %s2540_s10, %s2540_s10 }
  0x98   : > { %p2543_p7 = pnand %p2541_p5, %p2843_p8  ;;  %p2550_p11 = por %p2549_p10, %p2548_p4 }
  0x9a   : > { %p2544_p9 = pneg %p2543_p7 }
  0x9c   : > { %p2551_p12 = pnand %p2550_p11, %p2544_p9 }
  0x9e   : > { %2554 = shalt.err (!%p2551_p12)
}
  0x9f   : > { %2309 = dma.hbm_to_vmem [thread:$0]  (!%p2827_p6), %s3410_s6, 512, %s304_s21, [#allocation12], %s3392_s9, %s3392_s9, %s3394_s13  }
  0xa0   : > { %s2738_s2 = smov [#allocation14]   ;;  %s2555_s22 = scalar_lea.hbm %s3388_s7, 512 }
  0xa1   : > { %s316_s16 = sshll.u32 %s2738_s2, 4  ;;  %p2556_p1 = scmp.ne.s32.totalorder %s3388_s7, %s2555_s22  ;;  %s317_s16 = int_to_ptr.vmem [resolvable:$true] %s316_s16 }
  0xa2   : > { %p2562_p0 = scmp.lt.u32.totalorder %s2555_s22, %s3388_s7 }
  0xa3   : > { %p2558_p3 = pnand %p2556_p1, %p2843_p8 }
  0xa5   : > { %p2559_p13 = pneg %p2558_p3 }
  0xa7   : > { %p2564_p2 = pnand %p2562_p0, %p2559_p13 }
  0xa9   : > { %2567 = shalt.err (!%p2564_p2)
}
  0xaa   : > { %s2568_s21 = scalar_lea.vmem %s317_s16, 512  ;;  %p2576_p4 = scmp.lt.s32.totalorder %s317_s16, %s317_s16 }
  0xab   : > { %p2569_p5 = scmp.ne.s32.totalorder %s317_s16, %s2568_s21  ;;  %p2577_p10 = scmp.lt.s32.totalorder %s2568_s21, %s2568_s21 }
  0xad   : > { %p2571_p7 = pnand %p2569_p5, %p2843_p8  ;;  %p2578_p11 = por %p2577_p10, %p2576_p4 }
  0xaf   : > { %p2572_p9 = pneg %p2571_p7 }
  0xb1   : > { %p2579_p12 = pnand %p2578_p11, %p2572_p9 }
  0xb3   : > { %2582 = shalt.err (!%p2579_p12)
}
  0xb4   : > { %2312 = dma.hbm_to_vmem [thread:$0]  (!%p2827_p6), %s3388_s7, 512, %s317_s16, [#allocation15], %s3392_s9, %s3392_s9, %s3394_s13  }
  0xb5   : > { %s1918_s15 = sadd.s32 4294967294, %s2729_s30   ;;  %s2984_s23 = sadd.s32 1, %s2729_s30  }
  0xb6   : > { %s34_s17 = ssub.s32 %s2729_s30, %s2984_s23  ;;  %s37_s2 = sadd.s32 1, %s2725_s29 }
  0xb7   : > { %p35_p8 = scmp.eq.s32.totalorder %s34_s17, 0  ;;  %p44_p1 = scmp.ne.s32.totalorder %s2725_s29, %s2721_s28 }
  0xb8   : > { %p45_p3 = scmp.eq.s32.totalorder %s2729_s30, 0  ;;  %p50_p13 = scmp.ne.s32.totalorder %s2721_s28, %s2717_s27 }
  0xb9   : > { %s2995_s18 = scalar_select %p35_p8, %s2725_s29, %s37_s2  }
  0xba   : > { %p2997_p0 = por %p45_p3, %p44_p1  ;;  %p3412_p2 = scmp.eq.s32.totalorder %s2811_s11, 0 }
  0xbb   : > { %p226_p5 = scmp.eq.s32.totalorder %s2811_s11, 1  ;;  %p232_p7 = scmp.eq.s32.totalorder %s1918_s15, 1 }
  0xbc   : > { %p3003_p6 = por %p3412_p2, %p50_p13  ;;  %p2330_p9 = scmp.lt.s32.totalorder %s2729_s30, 2 }
  0xbd   : > { %s3010_s22 = sand.u32 1, %s2725_s29   ;;  %p3012_p4 = por %p226_p5, %p44_p1 }
  0xbe   : > { %p3016_p10 = por %p232_p7, %p50_p13  ;;  %s1927_s26 = sshll.u32 %s3010_s22, 4 }
  0xbf   : > { %s3414_s24 = scalar_select %p3012_p4, 1, 0 }
  0xc0   : > { %s3415_s25 = scalar_select %p3016_p10, 1, 0 }
  0xc1   : > { %s1978_s14 = sshll.u32 %s2729_s30, 8  ;;  %s3416_s0 = sld [smem:[#allocation24_spill]] }
  0xc2   : > { %s334_s15 = scalar_lea.vmem [#allocation2], %s1927_s26  ;;  %p3031_p11 = pnand %p2330_p9, %p2997_p0 }
  0xc3   : > { %s341_s17 = sshll.u32 %s334_s15, 4  ;;  %s2261_s13 = smul.u32 24, %s3010_s22  ;;  %s3027_s17 = int_to_ptr.vmem [resolvable:$true] %s341_s17 }
  0xc4   : > { %s331_s21 = scalar_lea.sflag [#allocation3], %s3010_s22  ;;  %p2585_p8 = pneg %p3031_p11 }
  0xc7   : > { %s3025_s19 = scalar_lea.hbm %s3416_s0, %s1978_s14  ;;  %s2588_s20 = scalar_lea.hbm %s3416_s0, 512 }
  0xc8   : > { %s2583_s14 = scalar_lea.hbm %s3025_s19, 256  ;;  %p2589_p13 = scmp.lt.u32.totalorder %s3025_s19, %s3416_s0 }
  0xc9   : > { %p2584_p12 = scmp.ne.s32.totalorder %s3025_s19, %s2583_s14  ;;  %p2590_p0 = scmp.lt.u32.totalorder %s2588_s20, %s2583_s14 }
  0xca   : > { %p2592_p5 = scmp.lt.u32.totalorder %s2583_s14, %s3025_s19 }
  0xcb   : > { %p2586_p1 = pnand %p2585_p8, %p2584_p12  ;;  %p2591_p2 = por %p2590_p0, %p2589_p13 }
  0xcd   : > { %p2587_p3 = pneg %p2586_p1  ;;  %p2593_p7 = por %p2592_p5, %p2591_p2 }
  0xcf   : > { %p2594_p9 = pnand %p2593_p7, %p2587_p3 }
  0xd1   : > { %2597 = shalt.err (!%p2594_p9)
}
  0xd2   : > { %s2598_s9 = scalar_lea.vmem %s3027_s17, 256  ;;  %s2739_s26 = smov [#allocation2]  }
  0xd3   : > { %p2599_p12 = scmp.ne.s32.totalorder %s3027_s17, %s2598_s9  ;;  %s2603_s10 = sshll.u32 %s2739_s26, 4  ;;  %s2604_s10 = int_to_ptr.vmem [resolvable:$false] %s2603_s10 }
  0xd4   : > { %s2605_s3 = scalar_lea.vmem %s2604_s10, 512  ;;  %p2606_p4 = scmp.lt.s32.totalorder %s3027_s17, %s2604_s10 }
  0xd5   : > { %p2601_p1 = pnand %p2599_p12, %p2585_p8  ;;  %p2607_p13 = scmp.lt.s32.totalorder %s2605_s3, %s2598_s9 }
  0xd7   : > { %p2602_p10 = pneg %p2601_p1  ;;  %p2608_p0 = por %p2607_p13, %p2606_p4 }
  0xd9   : > { %p2609_p2 = pnand %p2608_p0, %p2602_p10 }
  0xdb   : > { %2612 = shalt.err (!%p2609_p2)
}
  0xdc   : > { %s3418_s14 = smov 8   ;;  %s3419_s20 = smov 128  }
  0xdd   : > { %2316 = dma.hbm_to_vmem [thread:$0]  (!%p3031_p11), %s3025_s19, 256, %s3027_s17, %s331_s21, %s3419_s20, %s3419_s20, %s3418_s14  }
  0xde   : > { %s2262_s15 = smul.u32 384, %s2729_s30  ;;  %s355_s9 = scalar_lea.vmem [#allocation5], %s2261_s13 }
  0xdf   : > { %s362_s26 = sshll.u32 %s355_s9, 4  ;;  %s3420_s4 = sand.u32 1, %s2729_s30   ;;  %s3076_s26 = int_to_ptr.vmem [resolvable:$true] %s362_s26 }
  0xe0   : > { %s3074_s0 = scalar_lea.hbm %s3382_s1, %s2262_s15  ;;  %s3080_s5 = scalar_lea.sflag [#allocation6], %s3420_s4 }
  0xe1   : > { %s2613_s6 = scalar_lea.hbm %s3074_s0, 384  ;;  %s2618_s19 = scalar_lea.hbm %s3382_s1, 768 }
  0xe2   : > { %p2614_p4 = scmp.ne.s32.totalorder %s3074_s0, %s2613_s6  ;;  %p2619_p5 = scmp.lt.u32.totalorder %s3074_s0, %s3382_s1 }
  0xe3   : > { %p2620_p7 = scmp.lt.u32.totalorder %s2618_s19, %s2613_s6  ;;  %p2622_p12 = scmp.lt.u32.totalorder %s2613_s6, %s3074_s0 }
  0xe4   : > { %p2616_p10 = pnand %p2614_p4, %p2585_p8 }
  0xe5   : > { %p2621_p9 = por %p2620_p7, %p2619_p5 }
  0xe6   : > { %p2617_p3 = pneg %p2616_p10 }
  0xe7   : > { %p2623_p1 = por %p2622_p12, %p2621_p9 }
  0xe9   : > { %p2624_p13 = pnand %p2623_p1, %p2617_p3 }
  0xeb   : > { %2627 = shalt.err (!%p2624_p13)
}
  0xec   : > { %s2628_s4 = scalar_lea.vmem %s3076_s26, 384  ;;  %s2740_s15 = smov [#allocation5]  }
  0xed   : > { %p2629_p0 = scmp.ne.s32.totalorder %s3076_s26, %s2628_s4  ;;  %s2633_s9 = sshll.u32 %s2740_s15, 4  ;;  %s2634_s9 = int_to_ptr.vmem [resolvable:$false] %s2633_s9 }
  0xee   : > { %s2635_s10 = scalar_lea.vmem %s2634_s9, 768  ;;  %p2636_p10 = scmp.lt.s32.totalorder %s3076_s26, %s2634_s9 }
  0xef   : > { %p2631_p2 = pnand %p2629_p0, %p2585_p8  ;;  %p2637_p5 = scmp.lt.s32.totalorder %s2635_s10, %s2628_s4 }
  0xf1   : > { %p2632_p4 = pneg %p2631_p2  ;;  %p2638_p7 = por %p2637_p5, %p2636_p10 }
  0xf3   : > { %p2639_p9 = pnand %p2638_p7, %p2632_p4 }
  0xf5   : > { %2642 = shalt.err (!%p2639_p9)
}
  0xf6   : > { %2319 = dma.hbm_to_vmem [thread:$0]  (!%p3031_p11), %s3074_s0, 384, %s3076_s26, %s3080_s5, %s3419_s20, %s3419_s20, %s3418_s14  }
  0xf7   : > { %p3421_p8 = scmp.ne.s32.totalorder %s3403_s12, 0 }
  0xf8   : > { %s3112_s6 = sand.u32 (!%p3421_p8), 1, %s2721_s28  }
  0xf9   : > { %374 = sbr.rel (%p3421_p8) target bundleno = 2234 (0x8ba), region = 52  ;;  %s1932_s3 = sshll.u32 (!%p3421_p8), %s3112_s6, 4 }
  0xfa   : > { %s377_s13 = scalar_lea.sflag (!%p3421_p8), [#allocation3], %s3112_s6  ;;  %s380_s22 = scalar_lea.vmem (!%p3421_p8), [#allocation2], %s1932_s3 }
 0x100   : > { %2688 = dma.done.wait (%p3003_p6), %s377_s13, 256  }
 0x101   : > { %2690 = vsyncadd (%p3003_p6), %s377_s13, 4294967040  ;;  %s385_s0 = sand.u32 1, %s2811_s11   ;;  %s2263_s5 = smul.u32 24, %s3112_s6 }
 0x102   : > { %s386_s12 = scalar_lea.sflag [#allocation6], %s385_s0 }
 0x103   : > { %s389_s2 = scalar_lea.vmem [#allocation5], %s2263_s5 }
 0x104   : > { %2692 = dma.done.wait (%p3003_p6), %s386_s12, 384  }
 0x105   : > { %2694 = vsyncadd (%p3003_p6), %s386_s12, 4294966912  ;;  %p3422_p11 = scmp.eq.s32.totalorder %s2811_s11, 0 }
 0x107   : > { %2696 = dma.done.wait (%p3422_p11), [#allocation6], 512   ;;  %p3423_p3 = pmov %p3422_p11 }
 0x109   : > { %2698 = vsyncadd (%p3423_p3), [#allocation6], 4294966784  ;;  %p3424_p12 = pmov %p3423_p3 }
 0x10a   : > { %p3425_p1 = pmov %p3423_p3 }
 0x10b   : > { %2700 = dma.done.wait (%p3424_p12), [#allocation9], 1024  }
 0x10c   : > { %2702 = vsyncadd (%p3425_p1), [#allocation9], 4294966272  ;;  %p3426_p13 = pmov %p3425_p1 }
 0x10d   : > { %p3427_p0 = pmov %p3425_p1 }
 0x10e   : > { %2704 = dma.done.wait (%p3426_p13), [#allocation12], 1024  }
 0x10f   : > { %2706 = vsyncadd (%p3427_p0), [#allocation12], 4294966272  ;;  %p3428_p6 = pmov %p3427_p0 }
 0x110   : > { %p3429_p2 = pmov %p3427_p0 }
 0x111   : > { %2708 = dma.done.wait (%p3428_p6), [#allocation15], 512  }
 0x112   : > { %2710 = vsyncadd (%p3429_p2), [#allocation15], 4294966784  ;;  %vm456_vm0 = vcmask 261120   ;;  %v3142_v0 = vld [vmem:[%s389_s2] sm:$0xff]  ;;  %v3144_v1 = vld [vmem:[%s389_s2 + $0x8] sm:$0xff]  ;;  %s1939_s16 = sshll.u32 %s3112_s6, 3 }
 0x113   : > { %v3146_v2 = vld [vmem:[%s380_s22] sm:$0xff]  ;;  %v489_v3 = vsel %vm456_vm0, %v3142_v0, 0.0  ;;  %v500_v4 = vmul.f32 %v3142_v0, %v3142_v0  ;;  %v490_v5 = vsel %vm456_vm0, %v3144_v1, 0.0  ;;  %v501_v6 = vmul.f32 %v3144_v1, %v3144_v1  ;;  %v3156_v7 = vld [vmem:[%s380_s22 + $0x8] sm:$0xff]  ;;  %v3158_v8 = vld [vmem:[%s389_s2 + $0x10] sm:$0xff]  ;;  %s3182_s14 = scalar_lea.vmem [#allocation16], %s1939_s16 }
 0x114   : > { %556 = vadd.xlane.f32.xlu0 %v489_v3  ;;  %v491_v9 = vadd.f32 %v490_v5, %v489_v3  ;;  %v457_v10 = vsel %vm456_vm0, %v3146_v2, 0.0  ;;  %v458_v11 = vsel %vm456_vm0, %v3156_v7, 0.0  ;;  %v492_v12 = vsel %vm456_vm0, %v3158_v8, 0.0  ;;  %v602_v61 = vld [vmem:[#allocation8] sm:$0xff]  ;;  %v603_v62 = vld [vmem:[#allocation8 + $0x8] sm:$0xff]  ;;  %vm3225_vm3 = vmpackc.low %vm456_vm0, %vm456_vm0  ;;  %s1975_s20 = sshll.u32 %s2811_s11, 7 }
 0x115   : > { %v503_v13 = vsel %vm456_vm0, %v500_v4, 0.0  ;;  %v504_v14 = vsel %vm456_vm0, %v501_v6, 0.0  ;;  %v459_v15 = vadd.f32 %v458_v11, %v457_v10  ;;  %v466_v16 = vmul.f32 %v3146_v2, %v3146_v2  ;;  %v604_v4 = vld [vmem:[#allocation8 + $0x10] sm:$0xff]  ;;  %s1768_s26 = sshll.u32 %s3182_s14, 4  ;;  %s3335_s21 = scalar_lea.hbm %s3389_s8, %s1975_s20  ;;  %s3337_s26 = int_to_ptr.vmem [resolvable:$true] %s1768_s26 }
 0x116   : > { %562 = vadd.xlane.f32.xlu1 %v503_v13  ;;  %v505_v17 = vadd.f32 %v504_v14, %v503_v13  ;;  %v493_v18 = vadd.f32 %v492_v12, %v491_v9  ;;  %v467_v19 = vmul.f32 %v3156_v7, %v3156_v7  ;;  %v502_v20 = vmul.f32 %v3158_v8, %v3158_v8  ;;  %s1755_s11 = scalar_lea.sflag [#allocation4], %s3112_s6  ;;  %s2643_s4 = scalar_lea.vmem %s3337_s26, 128 }
 0x117   : > { %v460_v21 = vrot.slane %v459_v15, 4  ;;  %v468_v23 = vsel %vm456_vm0, %v466_v16, 0.0  ;;  %vm1745_vm1 = vcmask 253952   ;;  %v2202_v63 = vpack.c.bf16 %v603_v62, %v602_v61  ;;  %p2644_p4 = scmp.ne.s32.totalorder %s3337_s26, %s2643_s4  ;;  %p3432_p10 = scmp.ne.s32.totalorder %s3414_s24, 0 }
 0x118   : > { %558 = vadd.xlane.f32.xlu0 %v490_v5  ;;  %v494_v22 = vrot.slane %v493_v18, 4  ;;  %v469_v24 = vsel %vm456_vm0, %v467_v19, 0.0  ;;  %v506_v25 = vsel %vm456_vm0, %v502_v20, 0.0  ;;  %v2741_v3 = vmov 0.0|0.0   ;;  %v605_v5 = vld [vmem:[#allocation8 + $0x18] sm:$0xff]  ;;  %s2744_s15 = smov [#allocation16]  }
 0x119   : > { %v461_v26 = vadd.f32 %v460_v21, %v459_v15  ;;  %v470_v27 = vadd.f32 %v469_v24, %v468_v23  ;;  %v507_v28 = vadd.f32 %v506_v25, %v505_v17  ;;  %2201 = vmatprep.subr.bf16.mxu1 %v2741_v3  ;;  %v2205_v6 = vpack.c.bf16 %v605_v5, %v604_v4  ;;  %v601_v15 = vld [vmem:[#allocation7 + $0x18] sm:$0xff]  ;;  %p2645_p5 = pnand %p2644_p4, %p3432_p10  ;;  %s2647_s9 = sshll.u32 %s2744_s15, 4  ;;  %s2648_s9 = int_to_ptr.vmem [resolvable:$false] %s2647_s9 }
 0x11a   : > { %564 = vadd.xlane.f32.xlu1 %v504_v14  ;;  %v495_v29 = vadd.f32 %v494_v22, %v493_v18  ;;  %2203 = vmatpush3.bf16.msra.mxu1 %v2202_v63  ;;  %vm2742_vm2 = vmmov 0   ;;  %v600_v14 = vld [vmem:[#allocation7 + $0x10] sm:$0xff]  ;;  %vm961_vm4 = vcmask 195584   ;;  %vm1752_vm7 = vcmask 254976   ;;  %s2649_s10 = scalar_lea.vmem %s2648_s9, 256  ;;  %p2650_p9 = scmp.lt.s32.totalorder %s3337_s26, %s2648_s9 }
 0x11b   : > { %v462_v30 = vrot.slane %v461_v26, 2  ;;  %v471_v31 = vrot.slane %v470_v27, 4  ;;  %v508_v32 = vrot.slane %v507_v28, 4  ;;  %2204 = vmatprep.subr.bf16.mxu1 %v2741_v3  ;;  %v2197_v16 = vpack.c.bf16 %v601_v15, %v600_v14  ;;  %p2646_p7 = pneg %p2645_p5  ;;  %p2651_p8 = scmp.lt.s32.totalorder %s2649_s10, %s2643_s4 }
 0x11c   : > { %528 = vadd.xlane.f32.xlu0 %v457_v10  ;;  %v496_v33 = vrot.slane %v495_v29, 2  ;;  %v2743_v10 = vmov 0.0  }
 0x11d   : > { %v463_v34 = vadd.f32 %v462_v30, %v461_v26  ;;  %v472_v35 = vadd.f32 %v471_v31, %v470_v27  ;;  %v509_v36 = vadd.f32 %v508_v32, %v507_v28  ;;  %2068 = vmatprep.mubr.msk.f32.mxu1 %vm2742_vm2, %v2743_v10  ;;  %1753 = vst.msk [vmem:[%s3182_s14 + $0x6] sm:$0x3] %vm1752_vm7, %v2743_v10  ;;  %p2652_p11 = por %p2651_p8, %p2650_p9 }
 0x11e   : > { %530 = vadd.xlane.f32.xlu1 %v458_v11  ;;  %v497_v37 = vadd.f32 %v496_v33, %v495_v29  ;;  %2206 = vmatpush3.bf16.msra.mxu1 %v2205_v6  ;;  %v598_v11 = vld [vmem:[#allocation7] sm:$0xff] }
 0x11f   : > { %v464_v38 = vrot.slane %v463_v34, 1  ;;  %v473_v39 = vrot.slane %v472_v35, 2  ;;  %v510_v40 = vrot.slane %v509_v36, 2  ;;  %p2653_p3 = pnand %p2652_p11, %p2646_p7 }
 0x120   : > { %v498_v41 = vrot.slane %v497_v37, 1  ;;  %560 = vadd.xlane.f32.xlu0 %v492_v12  ;;  %v599_v12 = vld [vmem:[#allocation7 + $0x8] sm:$0xff] }
 0x121   : > { %v465_v42 = vadd.f32 %v464_v38, %v463_v34  ;;  %v474_v43 = vadd.f32 %v473_v39, %v472_v35  ;;  %v511_v44 = vadd.f32 %v510_v40, %v509_v36  ;;  %v2193_v13 = vpack.c.bf16 %v599_v12, %v598_v11 }
 0x122   : > { %v499_v45 = vadd.f32 %v498_v41, %v497_v37  ;;  %532 = vadd.xlane.f32.xlu1 %v468_v23 }
 0x123   : > { %v3178_v46 = vmul.f32 0.0625, %v465_v42  ;;  %v475_v47 = vrot.slane %v474_v43, 1  ;;  %v512_v48 = vrot.slane %v511_v44, 1  ;;  %2194 = vmatprep.subr.bf16.mxu0 %v2193_v13 }
 0x124   : > { %v3180_v49 = vmul.f32 0.041666668, %v499_v45  ;;  %534 = vadd.xlane.f32.xlu0 %v469_v24  ;;  %2196 = vmatpush3.bf16.msra.mxu0 %v2193_v13 }
 0x125   : > { %1746 = vst.msk [vmem:[%s3182_s14] sm:$0x1] %vm1745_vm1, %v3178_v46  ;;  %v476_v50 = vadd.f32 %v475_v47, %v474_v43  ;;  %v478_v51 = vmul.f32 16.0, %v3178_v46  ;;  %v3188_v52 = vadd.f32 %v512_v48, %v511_v44  ;;  %2198 = vmatprep.subr.bf16.mxu0 %v2197_v16 }
 0x126   : > { %v515_v53 = vmul.f32 24.0, %v3180_v49  ;;  %566 = vadd.xlane.f32.xlu1 %v506_v25 }
 0x127   : > { %v479_v54 = vmul.f32 %v478_v51, %v3178_v46 }
 0x128   : > { %v3193_v55 = vmul.f32 %v515_v53, %v3180_v49  ;;  %2200 = vmatpush3.bf16.msra.mxu0 %v2197_v16 }
 0x129   : > { %v480_v56 = vsub.f32 %v476_v50, %v479_v54  ;;  %2207 = vmatprep.subr.bf16.mxu0 %v2741_v3 }
 0x12a   : > { %v517_v57 = vsub.f32 %v3188_v52, %v3193_v55  ;;  %v521_v52 = vsub.f32 %v3144_v1, %v3180_v49 }
 0x12b   : > { %v481_v58 = vmul.f32 0.06666667, %v480_v56 }
 0x12d   : > { %v482_v59 = vmax.f32 %v481_v58, 0.0 }
 0x12f   : > { %v483_v60 = vadd.f32 1e-05, %v482_v59 }
 0x131   : > { %2381 = vrsqrt.f32 %v483_v60 }
 0x13b   : > { %v3199_v9 = vpop.eup %2381 }
 0x13c   : > { %1747 = vst.msk [vmem:[%s3182_s14 + $0x1] sm:$0x1] %vm1745_vm1, %v3199_v9 }
 0x1a1   : > { %v557_v17 = vpop.xlane.xlu0 %556 }
 0x1a2   : > { %v568_v18 = vmul.f32 0.03125, %v557_v17 }
 0x1a3   : > { %v563_v19 = vpop.xlane.xlu1 %562 }
 0x1a4   : > { %v571_v20 = vmul.f32 32.0, %v568_v18  ;;  %v586_v5 = vsub.f32 %v3142_v0, %v568_v18 }
 0x1a5   : > { %v559_v21 = vpop.xlane.xlu0 %558 }
 0x1a6   : > { %v574_v22 = vmul.f32 %v571_v20, %v568_v18  ;;  %v569_v23 = vmul.f32 0.03125, %v559_v21 }
 0x1a7   : > { %v565_v24 = vpop.xlane.xlu1 %564 }
 0x1a8   : > { %v577_v25 = vsub.f32 %v563_v19, %v574_v22  ;;  %v572_v26 = vmul.f32 32.0, %v569_v23  ;;  %v587_v14 = vsub.f32 %v3144_v1, %v569_v23 }
 0x1a9   : > { %v529_v27 = vpop.xlane.xlu0 %528 }
 0x1aa   : > { %v580_v28 = vmul.f32 0.032258064, %v577_v25  ;;  %v575_v29 = vmul.f32 %v572_v26, %v569_v23  ;;  %v536_v30 = vmul.f32 0.03125, %v529_v27 }
 0x1ab   : > { %v531_v31 = vpop.xlane.xlu1 %530 }
 0x1ac   : > { %v583_v32 = vmax.f32 %v580_v28, 0.0  ;;  %v578_v33 = vsub.f32 %v565_v24, %v575_v29  ;;  %v537_v34 = vmul.f32 0.03125, %v531_v31  ;;  %v538_v35 = vmul.f32 32.0, %v536_v30 }
 0x1ad   : > { %v561_v36 = vpop.xlane.xlu0 %560  ;;  %v548_v17 = vsub.f32 %v3146_v2, %v536_v30 }
 0x1ae   : > { %v589_v37 = vadd.f32 1e-05, %v583_v32  ;;  %v581_v38 = vmul.f32 0.032258064, %v578_v33  ;;  %v570_v39 = vmul.f32 0.03125, %v561_v36  ;;  %v540_v41 = vmul.f32 %v538_v35, %v536_v30 }
 0x1af   : > { %v533_v40 = vpop.xlane.xlu1 %532  ;;  %v539_v42 = vmul.f32 32.0, %v537_v34  ;;  %v549_v19 = vsub.f32 %v3156_v7, %v537_v34 }
 0x1b0   : > { %2383 = vrsqrt.f32 %v589_v37  ;;  %v584_v43 = vmax.f32 %v581_v38, 0.0  ;;  %v573_v44 = vmul.f32 32.0, %v570_v39  ;;  %v542_v45 = vsub.f32 %v533_v40, %v540_v41  ;;  %v606_v38 = vld [vmem:[#allocation10] sm:$0xff]  ;;  %v608_v40 = vld [vmem:[#allocation10 + $0x10] sm:$0xff] }
 0x1b1   : > { %v541_v47 = vmul.f32 %v539_v42, %v537_v34  ;;  %v535_v48 = vpop.xlane.xlu0 %534  ;;  %v588_v22 = vsub.f32 %v3158_v8, %v570_v39  ;;  %v609_v42 = vld [vmem:[#allocation10 + $0x18] sm:$0xff] }
 0x1b2   : > { %v590_v50 = vadd.f32 1e-05, %v584_v43  ;;  %v576_v51 = vmul.f32 %v573_v44, %v570_v39  ;;  %v544_v53 = vmul.f32 0.032258064, %v542_v45  ;;  %v607_v39 = vld [vmem:[#allocation10 + $0x8] sm:$0xff]  ;;  %v2211_v43 = vpack.c.bf16 %v609_v42, %v608_v40  ;;  %v1184_v42 = vld [vmem:[#allocation13 + $0x18] sm:$0xff] }
 0x1b3   : > { %v543_v54 = vsub.f32 %v535_v48, %v541_v47  ;;  %v567_v56 = vpop.xlane.xlu1 %566  ;;  %v2208_v41 = vpack.c.bf16 %v607_v39, %v606_v38 }
 0x1b4   : > { %2385 = vrsqrt.f32 %v590_v50  ;;  %v579_v58 = vsub.f32 %v567_v56, %v576_v51  ;;  %v546_v59 = vmax.f32 %v544_v53, 0.0 }
 0x1b5   : > { %v545_v60 = vmul.f32 0.032258064, %v543_v54 }
 0x1b6   : > { %v582_v61 = vmul.f32 0.032258064, %v579_v58  ;;  %v550_v62 = vadd.f32 1e-05, %v546_v59 }
 0x1b7   : > { %v547_v63 = vmax.f32 %v545_v60, 0.0 }
 0x1b8   : > { %v585_v4 = vmax.f32 %v582_v61, 0.0  ;;  %2387 = vrsqrt.f32 %v550_v62 }
 0x1b9   : > { %v551_v6 = vadd.f32 1e-05, %v547_v63 }
 0x1ba   : > { %v2384_v11 = vpop.eup %2383  ;;  %v591_v12 = vadd.f32 1e-05, %v585_v4 }
 0x1bb   : > { %2389 = vrsqrt.f32 %v551_v6  ;;  %v595_v13 = vmul.f32 %v2384_v11, %v586_v5 }
 0x1bc   : > { %2391 = vrsqrt.f32 %v591_v12 }
 0x1bd   : > { %2069 = vmatmul.mubr.msk.f32.vlgmr.msra.gmra.mrb[0].mxu1 %vm456_vm0, %v595_v13 }
 0x1be   : > { %v2386_v15 = vpop.eup %2385  ;;  %2071 = vmatprep.mubr.msk.f32.mxu1 %vm2742_vm2, %v2743_v10 }
 0x1bf   : > { %v596_v16 = vmul.f32 %v2386_v15, %v587_v14  ;;  %v518_v15 = vmul.f32 0.04347826, %v517_v57  ;;  %v1177_v57 = vld [vmem:[#allocation11] sm:$0xff] }
 0x1c1   : > { %2072 = vmatmul.mubr.msk.f32.gmra.mrb[2].mxu1 %vm456_vm0, %v596_v16  ;;  %v519_v16 = vmax.f32 %v518_v15, 0.0 }
 0x1c2   : > { %2074 = vmatprep.mubr.msk.f32.mxu1 %vm2742_vm2, %v2743_v10  ;;  %v2388_v18 = vpop.eup %2387 }
 0x1c3   : > { %v554_v20 = vmul.f32 %v2388_v18, %v548_v17  ;;  %v523_v17 = vadd.f32 1e-05, %v519_v16 }
 0x1c5   : > { %v2390_v21 = vpop.eup %2389  ;;  %2057 = vmatprep.mubr.msk.f32.mxu0 %vm456_vm0, %v554_v20 }
 0x1c6   : > { %v2392_v23 = vpop.eup %2391  ;;  %v555_v24 = vmul.f32 %v2390_v21, %v549_v19 }
 0x1c7   : > { %v597_v25 = vmul.f32 %v2392_v23, %v588_v22  ;;  %v520_v22 = vsub.f32 %v3142_v0, %v3180_v49 }
 0x1c8   : > { %2058 = vmatmul.mubr.msk.f32.vlgmr.msra.gmra.mrb[0].mxu0 %vm456_vm0, %v555_v24  ;;  %v1178_v24 = vld [vmem:[#allocation11 + $0x8] sm:$0xff] }
 0x1c9   : > { %2075 = vmatmul.mubr.msk.f32.gmra.mrb[4].mxu1 %vm456_vm0, %v597_v25  ;;  %2085 = vmatprep.mubr.msk.f32.mxu0 %vm2742_vm2, %v2743_v10  ;;  %v2227_v25 = vpack.c.bf16 %v1178_v24, %v1177_v57 }
 0x1ca   : > { %2209 = vmatpush3.bf16.msra.mxu0 %v2208_v41  ;;  %v1183_v41 = vld [vmem:[#allocation13 + $0x10] sm:$0xff] }
 0x1cb   : > { %2210 = vmatprep.subr.bf16.mxu0 %v2741_v3 }
 0x1ce   : > { %2212 = vmatpush3.bf16.msra.mxu0 %v2211_v43 }
 0x1d1   : > { %2086 = vmatmul.mubr.msk.f32.vlgmr.msra.gmra.mrb[2].mxu0 %vm456_vm0, %v3142_v0 }
 0x1d2   : > { %2088 = vmatprep.mubr.msk.f32.mxu0 %vm2742_vm2, %v2743_v10 }
 0x1d5   : > { %2089 = vmatmul.mubr.msk.f32.gmra.mrb[4].mxu0 %vm456_vm0, %v3144_v1 }
 0x1d6   : > { %2091 = vmatprep.mubr.msk.f32.mxu0 %vm2742_vm2, %v2743_v10 }
 0x1d9   : > { %2092 = vmatmul.mubr.msk.f32.gmra.mrb[6].mxu0 %vm456_vm0, %v3158_v8 }
 0x290   : > { %v768_v26 = vpop.f32.mrb[0].mxu1 }
 0x291   : > { %v2070_v27 = vpop.f32.mrb[1].mxu1 }
 0x294   : > { %v773_v28 = vpop.f32.mrb[2].mxu1 }
 0x295   : > { %v2213_v30 = vpack.c.bf16 %v773_v28, %v768_v26  ;;  %v2073_v31 = vpop.f32.mrb[3].mxu1  ;;  %v522_v26 = vsub.f32 %v3158_v8, %v3180_v49 }
 0x296   : > { %v1181_v31 = vld [vmem:[#allocation13] sm:$0xff] }
 0x297   : > { %2215 = vmatprep.subr.msk.bf16.mxu1 %vm3225_vm3, %v2213_v30 }
 0x298   : > { %2218 = vmatpush3.bf16.xpose.msk.msra.mxu1 %vm3225_vm3, %v2213_v30 }
 0x29b   : > { %v2059_v32 = vpop.f32.mrb[0].mxu0 }
 0x29c   : > { %v682_v33 = vpop.f32.mrb[1].mxu0  ;;  %v778_v34 = vpop.f32.mrb[4].mxu1  ;;  %v692_v37 = vmul.f32 0.17677669, %v2059_v32  ;;  %v1182_v32 = vld [vmem:[#allocation13 + $0x8] sm:$0xff] }
 0x29d   : > { %v691_v35 = vmul.f32 0.17677669, %v682_v33  ;;  %v2076_v36 = vpop.f32.mrb[5].mxu1  ;;  %2098 = vmatprep.subr.msk.mxu1 %vm456_vm0, %v778_v34  ;;  %v2236_v39 = vpack.c.bf16 %v1182_v32, %v1181_v31 }
 0x29e   : > { %v1179_v36 = vld [vmem:[#allocation11 + $0x10] sm:$0xff] }
 0x29f   : > { %2100 = vmatprep.mubr.msk.f32.mxu1 %vm456_vm0, %v691_v35 }
 0x2a0   : > { %2099 = vmatpush3.xpose.msk.msra.mxu1 %vm456_vm0, %v778_v34  ;;  %v485_v34 = vsub.f32 %v3146_v2, %v3178_v46  ;;  %v486_v2 = vsub.f32 %v3156_v7, %v3178_v46 }
 0x2a2   : > { %v487_v43 = vmul.f32 %v3199_v9, %v485_v34 }
 0x2a3   : > { %2101 = vmatmul.mubr.msk.f32.vlgmr.msra.gmra.mrb[6].mxu1 %vm456_vm0, %v692_v37  ;;  %v1180_v37 = vld [vmem:[#allocation11 + $0x18] sm:$0xff] }
 0x2a4   : > { %v857_v50 = vpop.f32.mrb[2].mxu0  ;;  %v2231_v49 = vpack.c.bf16 %v1180_v37, %v1179_v36  ;;  %v1186_v36 = vld [vmem:[#allocation14 + $0x8] sm:$0xff]  ;;  %v1187_v37 = vld [vmem:[#allocation14 + $0x10] sm:$0xff] }
 0x2a5   : > { %v2087_v51 = vpop.f32.mrb[3].mxu0  ;;  %v1065_v53 = vmul.f32 %v857_v50, %v857_v50 }
 0x2a8   : > { %v862_v54 = vpop.f32.mrb[4].mxu0 }
 0x2a9   : > { %v2219_v56 = vpack.c.bf16 %v862_v54, %v857_v50  ;;  %v1066_v58 = vmul.f32 %v862_v54, %v862_v54  ;;  %v2090_v59 = vpop.f32.mrb[5].mxu0 }
 0x2ab   : > { %v2223_v60 = vpack.c.bf16 %v1066_v58, %v1065_v53  ;;  %2220 = vmatprep.subr.bf16.mxu1 %v2219_v56 }
 0x2ac   : > { %2222 = vmatpush3.bf16.msra.mxu1 %v2219_v56  ;;  %v867_v18 = vpop.f32.mrb[6].mxu0 }
 0x2ad   : > { %2224 = vmatprep.subr.bf16.mxu0 %v2223_v60  ;;  %v1067_v19 = vmul.f32 %v867_v18, %v867_v18  ;;  %v2093_v20 = vpop.f32.mrb[7].mxu0  ;;  %2107 = vmatprep.subr.mxu1 %v867_v18 }
 0x2ae   : > { %2226 = vmatpush3.bf16.msra.mxu0 %v2223_v60 }
 0x2af   : > { %2116 = vmatprep.subr.mxu0 %v1067_v19 }
 0x2b0   : > { %2108 = vmatpush3.msra.mxu1 %v867_v18 }
 0x2b1   : > { %2228 = vmatprep.subr.bf16.mxu1 %v2227_v25 }
 0x2b2   : > { %2117 = vmatpush3.msra.mxu0 %v1067_v19 }
 0x2b3   : > { %2235 = vmatprep.subr.bf16.mxu0 %v2741_v3 }
 0x376   : > { %v2102_v44 = vpop.f32.mrb[6].mxu1 }
 0x377   : > { %v952_v45 = vpop.f32.mrb[7].mxu1  ;;  %v965_v47 = vsel %vm961_vm4, %v2102_v44, -inf }
 0x378   : > { %966 = vmax.xlane.f32.xlu1 %v965_v47  ;;  %v962_v48 = vsel %vm961_vm4, %v952_v45, -inf }
 0x379   : > { %963 = vmax.xlane.f32.xlu0 %v962_v48 }
 0x405   : > { %v967_v61 = vpop.xlane.xlu1 %966 }
 0x406   : > { %v969_v62 = vsub.f32 %v2102_v44, %v967_v61  ;;  %v964_v63 = vpop.xlane.xlu0 %963  ;;  %v2239_v44 = vpack.c.bf16 %v1184_v42, %v1183_v41 }
 0x407   : > { %v968_v4 = vsub.f32 %v952_v45, %v964_v63  ;;  %v488_v45 = vmul.f32 %v3199_v9, %v486_v2 }
 0x408   : > { %v972_v5 = vmul.f32 1.442695, %v969_v62 }
 0x409   : > { %v970_v6 = vmul.f32 1.442695, %v968_v4 }
 0x40a   : > { %2393 = vpow2.f32 %v972_v5 }
 0x40b   : > { %2395 = vpow2.f32 %v970_v6 }
 0x40c   : > { %2397 = vrsqrt.f32 %v523_v17 }
 0x414   : > { %v2394_v11 = vpop.eup %2393 }
 0x415   : > { %v2396_v12 = vpop.eup %2395  ;;  %v977_v13 = vsel %vm961_vm4, %v2394_v11, 0.0 }
 0x416   : > { %978 = vadd.xlane.f32.xlu1 %v977_v13  ;;  %v974_v14 = vsel %vm961_vm4, %v2396_v12, 0.0  ;;  %v2398_v21 = vpop.eup %2397 }
 0x417   : > { %975 = vadd.xlane.f32.xlu0 %v974_v14  ;;  %v525_v23 = vmul.f32 %v2398_v21, %v520_v22  ;;  %v526_v55 = vmul.f32 %v2398_v21, %v521_v52  ;;  %v527_v27 = vmul.f32 %v2398_v21, %v522_v26 }
 0x4a3   : > { %v979_v28 = vpop.xlane.xlu1 %978 }
 0x4a4   : > { %2399 = vrcp.f32 %v979_v28  ;;  %v976_v30 = vpop.xlane.xlu0 %975 }
 0x4a5   : > { %2401 = vrcp.f32 %v976_v30 }
 0x4ae   : > { %v2400_v33 = vpop.eup %2399 }
 0x4af   : > { %v2402_v35 = vpop.eup %2401  ;;  %v983_v40 = vmul.f32 %v2400_v33, %v2394_v11 }
 0x4b0   : > { %v981_v38 = vmul.f32 %v2402_v35, %v2396_v12  ;;  %v1185_v35 = vld [vmem:[#allocation14] sm:$0xff] }
 0x4b2   : > { %2109 = vmatprep.mubr.msk.f32.mxu1 %vm961_vm4, %v981_v38  ;;  %2118 = vmatprep.mubr.msk.f32.mxu0 %vm961_vm4, %v981_v38  ;;  %v2242_v38 = vpack.c.bf16 %v1186_v36, %v1185_v35 }
 0x4b3   : > { %2110 = vmatmul.mubr.msk.f32.vlgmr.msra.gmra.mrb[8].mxu1 %vm961_vm4, %v983_v40  ;;  %2119 = vmatmul.mubr.msk.f32.vlgmr.msra.gmra.mrb[8].mxu0 %vm961_vm4, %v983_v40 }
 0x4b4   : > { %2237 = vmatpush3.bf16.msra.mxu0 %v2236_v39  ;;  %2140 = vmatprep.mubr.msk.f32.mxu0 %vm2742_vm2, %v2743_v10  ;;  %v1188_v39 = vld [vmem:[#allocation14 + $0x18] sm:$0xff] }
 0x4b5   : > { %2238 = vmatprep.subr.bf16.mxu0 %v2741_v3  ;;  %2230 = vmatpush3.bf16.msra.mxu1 %v2227_v25  ;;  %v2245_v40 = vpack.c.bf16 %v1188_v39, %v1187_v37 }
 0x4b6   : > { %2232 = vmatprep.subr.bf16.mxu1 %v2231_v49  ;;  %2129 = vmatprep.mubr.msk.f32.mxu1 %vm456_vm0, %v487_v43 }
 0x4b8   : > { %2240 = vmatpush3.bf16.msra.mxu0 %v2239_v44 }
 0x4b9   : > { %2234 = vmatpush3.bf16.msra.mxu1 %v2231_v49 }
 0x4ba   : > { %2241 = vmatprep.subr.bf16.mxu1 %v2741_v3 }
 0x4bb   : > { %2141 = vmatmul.mubr.msk.f32.vlgmr.msra.gmra.mrb[10].mxu0 %vm456_vm0, %v525_v23 }
 0x4bc   : > { %2143 = vmatprep.mubr.msk.f32.mxu0 %vm2742_vm2, %v2743_v10  ;;  %2130 = vmatmul.mubr.msk.f32.vlgmr.msra.gmra.mrb[10].mxu1 %vm456_vm0, %v488_v45 }
 0x4bd   : > { %2157 = vmatprep.mubr.msk.f32.mxu1 %vm2742_vm2, %v2743_v10  ;;  %2243 = vmatpush3.bf16.msra.mxu1 %v2242_v38 }
 0x4be   : > { %2244 = vmatprep.subr.bf16.mxu1 %v2741_v3 }
 0x4bf   : > { %2144 = vmatmul.mubr.msk.f32.gmra.mrb[12].mxu0 %vm456_vm0, %v526_v55 }
 0x4c0   : > { %2146 = vmatprep.mubr.msk.f32.mxu0 %vm2742_vm2, %v2743_v10 }
 0x4c1   : > { %2246 = vmatpush3.bf16.msra.mxu1 %v2245_v40 }
 0x4c3   : > { %2147 = vmatmul.mubr.msk.f32.gmra.mrb[14].mxu0 %vm456_vm0, %v527_v27 }
 0x4c4   : > { %2158 = vmatmul.mubr.msk.f32.vlgmr.msra.gmra.mrb[12].mxu1 %vm456_vm0, %v3142_v0 }
 0x4c5   : > { %2160 = vmatprep.mubr.msk.f32.mxu1 %vm2742_vm2, %v2743_v10 }
 0x4c8   : > { %2161 = vmatmul.mubr.msk.f32.gmra.mrb[14].mxu1 %vm456_vm0, %v3144_v1 }
 0x4c9   : > { %2163 = vmatprep.mubr.msk.f32.mxu1 %vm2742_vm2, %v2743_v10 }
 0x4cc   : > { %2164 = vmatmul.mubr.msk.f32.gmra.mrb[16].mxu1 %vm456_vm0, %v3158_v8 }
 0x586   : > { %v2111_v7 = vpop.f32.mrb[8].mxu1  ;;  %v2120_v46 = vpop.f32.mrb[8].mxu0 }
 0x587   : > { %v1144_v9 = vmul.f32 %v2111_v7, %v2111_v7  ;;  %v1150_v47 = vsel %vm456_vm0, %v2111_v7, 0.0  ;;  %v1056_v48 = vpop.f32.mrb[9].mxu1  ;;  %v1134_v50 = vpop.f32.mrb[9].mxu0 }
 0x588   : > { %v1143_v51 = vmul.f32 %v1056_v48, %v1056_v48  ;;  %v1149_v53 = vsel %vm456_vm0, %v1056_v48, 0.0 }
 0x589   : > { %v1146_v54 = vsub.f32 %v2120_v46, %v1144_v9  ;;  %v1151_v56 = vadd.f32 %v1150_v47, %v1149_v53 }
 0x58a   : > { %v1145_v58 = vsub.f32 %v1134_v50, %v1143_v51 }
 0x58b   : > { %v1148_v59 = vmax.f32 %v1146_v54, 0.0  ;;  %v1152_v60 = vrot.slane %v1151_v56, 4 }
 0x58c   : > { %v1147_v61 = vmax.f32 %v1145_v58, 0.0 }
 0x58d   : > { %v1161_v62 = vsel %vm456_vm0, %v1148_v59, 0.0  ;;  %v1153_v63 = vadd.f32 %v1152_v60, %v1151_v56 }
 0x58e   : > { %v1160_v4 = vsel %vm456_vm0, %v1147_v61, 0.0  ;;  %v1347_v5 = vpop.f32.mrb[10].mxu0 }
 0x58f   : > { %v1154_v6 = vrot.slane %v1153_v63, 2  ;;  %v1162_v11 = vadd.f32 %v1161_v62, %v1160_v4  ;;  %v2142_v12 = vpop.f32.mrb[11].mxu0  ;;  %v2131_v13 = vpop.f32.mrb[10].mxu1 }
 0x590   : > { %v1261_v14 = vpop.f32.mrb[11].mxu1  ;;  %v1271_v30 = vmul.f32 0.17677669, %v2131_v13 }
 0x591   : > { %v1155_v15 = vadd.f32 %v1154_v6, %v1153_v63  ;;  %v1163_v16 = vrot.slane %v1162_v11, 4  ;;  %v1270_v17 = vmul.f32 0.17677669, %v1261_v14 }
 0x592   : > { %v1352_v18 = vpop.f32.mrb[12].mxu0 }
 0x593   : > { %v1156_v19 = vrot.slane %v1155_v15, 1  ;;  %v1164_v20 = vadd.f32 %v1163_v16, %v1162_v11  ;;  %v2247_v21 = vpack.c.bf16 %v1352_v18, %v1347_v5  ;;  %v2145_v22 = vpop.f32.mrb[13].mxu0  ;;  %2172 = vmatprep.mubr.msk.f32.mxu0 %vm456_vm0, %v1270_v17 }
 0x595   : > { %v1157_v23 = vadd.f32 %v1156_v19, %v1155_v15  ;;  %v1165_v52 = vrot.slane %v1164_v20, 2  ;;  %2249 = vmatprep.subr.msk.bf16.mxu0 %vm3225_vm3, %v2247_v21 }
 0x596   : > { %2252 = vmatpush3.bf16.xpose.msk.msra.mxu0 %vm3225_vm3, %v2247_v21  ;;  %v1357_v55 = vpop.f32.mrb[14].mxu0 }
 0x597   : > { %v1159_v57 = vmul.f32 0.0625, %v1157_v23  ;;  %v1166_v24 = vadd.f32 %v1165_v52, %v1164_v20  ;;  %v2148_v25 = vpop.f32.mrb[15].mxu0  ;;  %2170 = vmatprep.subr.msk.mxu0 %vm456_vm0, %v1357_v55  ;;  %v1427_v0 = vpop.f32.mrb[12].mxu1 }
 0x598   : > { %v2159_v43 = vpop.f32.mrb[13].mxu1  ;;  %v1634_v2 = vmul.f32 %v1427_v0, %v1427_v0 }
 0x599   : > { %1748 = vst.msk [vmem:[%s3182_s14 + $0x2] sm:$0x1] %vm1745_vm1, %v1159_v57  ;;  %v1167_v26 = vrot.slane %v1166_v24, 1 }
 0x59b   : > { %v1168_v27 = vadd.f32 %v1167_v26, %v1166_v24  ;;  %v1432_v44 = vpop.f32.mrb[14].mxu1 }
 0x59c   : > { %v2253_v45 = vpack.c.bf16 %v1432_v44, %v1427_v0  ;;  %v1635_v1 = vmul.f32 %v1432_v44, %v1432_v44  ;;  %v2162_v7 = vpop.f32.mrb[15].mxu1 }
 0x59d   : > { %v1169_v28 = vmul.f32 0.0625, %v1168_v27 }
 0x59e   : > { %2171 = vmatpush3.xpose.msk.msra.mxu0 %vm456_vm0, %v1357_v55  ;;  %v2257_v46 = vpack.c.bf16 %v1635_v1, %v1634_v2 }
 0x59f   : > { %2403 = vrsqrt.f32 %v1169_v28  ;;  %vm1172_vm5 = vcmp.eq.f32.partialorder %v1169_v28, inf  ;;  %v1175_v32 = vand.u32 2147483648, %v1169_v28  ;;  %vm1174_vm6 = vcmp.eq.f32.partialorder %v1169_v28, 0.0  ;;  %2254 = vmatprep.subr.bf16.mxu0 %v2253_v45  ;;  %v1437_v59 = vpop.f32.mrb[16].mxu1 }
 0x5a0   : > { %2258 = vmatprep.subr.bf16.mxu1 %v2257_v46  ;;  %v1636_v60 = vmul.f32 %v1437_v59, %v1437_v59  ;;  %v2165_v61 = vpop.f32.mrb[17].mxu1 }
 0x5a1   : > { %2173 = vmatmul.mubr.msk.f32.vlgmr.msra.gmra.mrb[16].mxu0 %vm456_vm0, %v1271_v30  ;;  %2260 = vmatpush3.bf16.msra.mxu1 %v2257_v46 }
 0x5a2   : > { %2256 = vmatpush3.bf16.msra.mxu0 %v2253_v45  ;;  %2188 = vmatprep.subr.mxu1 %v1636_v60 }
 0x5a3   : > { %2179 = vmatprep.subr.mxu0 %v1437_v59 }
 0x5a5   : > { %2189 = vmatpush3.msra.mxu1 %v1636_v60 }
 0x5a6   : > { %2180 = vmatpush3.msra.mxu0 %v1437_v59 }
 0x5a9   : > { %v2404_v29 = vpop.eup %2403 }
 0x5aa   : > { %v1171_v31 = vmul.f32 %v2404_v29, %v1169_v28 }
 0x5ac   : > { %v1173_v33 = vsel %vm1172_vm5, %v1169_v28, %v1171_v31 }
 0x5ad   : > { %v1176_v34 = vsel %vm1174_vm6, %v1175_v32, %v1173_v33 }
 0x5ae   : > { %1749 = vst.msk [vmem:[%s3182_s14 + $0x3] sm:$0x1] %vm1745_vm1, %v1176_v34 }
 0x674   : > { %v2174_v41 = vpop.f32.mrb[16].mxu0 }
 0x675   : > { %v1522_v42 = vpop.f32.mrb[17].mxu0  ;;  %v1534_v3 = vsel %vm961_vm4, %v2174_v41, -inf }
 0x676   : > { %1535 = vmax.xlane.f32.xlu1 %v1534_v3  ;;  %v1531_v49 = vsel %vm961_vm4, %v1522_v42, -inf }
 0x677   : > { %1532 = vmax.xlane.f32.xlu0 %v1531_v49 }
 0x703   : > { %v1536_v8 = vpop.xlane.xlu1 %1535 }
 0x704   : > { %v1538_v9 = vsub.f32 %v2174_v41, %v1536_v8  ;;  %v1533_v47 = vpop.xlane.xlu0 %1532 }
 0x705   : > { %v1537_v48 = vsub.f32 %v1522_v42, %v1533_v47 }
 0x706   : > { %v1541_v50 = vmul.f32 1.442695, %v1538_v9 }
 0x707   : > { %v1539_v51 = vmul.f32 1.442695, %v1537_v48 }
 0x708   : > { %2405 = vpow2.f32 %v1541_v50 }
 0x709   : > { %2407 = vpow2.f32 %v1539_v51 }
 0x712   : > { %v2406_v53 = vpop.eup %2405 }
 0x713   : > { %v2408_v54 = vpop.eup %2407  ;;  %v1546_v56 = vsel %vm961_vm4, %v2406_v53, 0.0 }
 0x714   : > { %1547 = vadd.xlane.f32.xlu1 %v1546_v56  ;;  %v1543_v58 = vsel %vm961_vm4, %v2408_v54, 0.0 }
 0x715   : > { %1544 = vadd.xlane.f32.xlu0 %v1543_v58 }
 0x7a1   : > { %v1548_v62 = vpop.xlane.xlu1 %1547 }
 0x7a2   : > { %2409 = vrcp.f32 %v1548_v62  ;;  %v1545_v63 = vpop.xlane.xlu0 %1544 }
 0x7a3   : > { %2411 = vrcp.f32 %v1545_v63 }
 0x7ac   : > { %v2410_v4 = vpop.eup %2409 }
 0x7ad   : > { %v2412_v5 = vpop.eup %2411  ;;  %v1552_v11 = vmul.f32 %v2410_v4, %v2406_v53 }
 0x7ae   : > { %v1550_v6 = vmul.f32 %v2412_v5, %v2408_v54 }
 0x7b0   : > { %2181 = vmatprep.mubr.msk.f32.mxu0 %vm961_vm4, %v1550_v6  ;;  %2190 = vmatprep.mubr.msk.f32.mxu1 %vm961_vm4, %v1550_v6 }
 0x7b1   : > { %2182 = vmatmul.mubr.msk.f32.vlgmr.msra.gmra.mrb[18].mxu0 %vm961_vm4, %v1552_v11  ;;  %2191 = vmatmul.mubr.msk.f32.vlgmr.msra.gmra.mrb[18].mxu1 %vm961_vm4, %v1552_v11 }
 0x884   : > { %v2183_v12 = vpop.f32.mrb[18].mxu0  ;;  %v2192_v13 = vpop.f32.mrb[18].mxu1 }
 0x885   : > { %v1713_v14 = vmul.f32 %v2183_v12, %v2183_v12  ;;  %v1719_v15 = vsel %vm456_vm0, %v2183_v12, 0.0  ;;  %v1625_v16 = vpop.f32.mrb[19].mxu0  ;;  %v1703_v17 = vpop.f32.mrb[19].mxu1 }
 0x886   : > { %v1712_v18 = vmul.f32 %v1625_v16, %v1625_v16  ;;  %v1718_v19 = vsel %vm456_vm0, %v1625_v16, 0.0 }
 0x887   : > { %v1715_v20 = vsub.f32 %v2192_v13, %v1713_v14  ;;  %v1720_v21 = vadd.f32 %v1719_v15, %v1718_v19 }
 0x888   : > { %v1714_v22 = vsub.f32 %v1703_v17, %v1712_v18 }
 0x889   : > { %v1717_v23 = vmax.f32 %v1715_v20, 0.0  ;;  %v1721_v52 = vrot.slane %v1720_v21, 4 }
 0x88a   : > { %v1716_v55 = vmax.f32 %v1714_v22, 0.0 }
 0x88b   : > { %v1729_v57 = vsel %vm456_vm0, %v1717_v23, 0.0  ;;  %v1722_v10 = vadd.f32 %v1721_v52, %v1720_v21 }
 0x88c   : > { %v1728_v24 = vsel %vm456_vm0, %v1716_v55, 0.0 }
 0x88d   : > { %v1723_v25 = vrot.slane %v1722_v10, 2  ;;  %v1730_v26 = vadd.f32 %v1729_v57, %v1728_v24 }
 0x88f   : > { %v1724_v27 = vadd.f32 %v1723_v25, %v1722_v10  ;;  %v1731_v28 = vrot.slane %v1730_v26, 4 }
 0x891   : > { %v1725_v30 = vrot.slane %v1724_v27, 1  ;;  %v1732_v29 = vadd.f32 %v1731_v28, %v1730_v26 }
 0x893   : > { %v1726_v31 = vadd.f32 %v1725_v30, %v1724_v27  ;;  %v1733_v32 = vrot.slane %v1732_v29, 2 }
 0x895   : > { %v1727_v33 = vmul.f32 0.0625, %v1726_v31  ;;  %v1734_v34 = vadd.f32 %v1733_v32, %v1732_v29 }
 0x897   : > { %1750 = vst.msk [vmem:[%s3182_s14 + $0x4] sm:$0x1] %vm1745_vm1, %v1727_v33  ;;  %v1735_v35 = vrot.slane %v1734_v34, 1 }
 0x899   : > { %v1736_v36 = vadd.f32 %v1735_v35, %v1734_v34 }
 0x89b   : > { %v1737_v37 = vmul.f32 0.0625, %v1736_v36 }
 0x89d   : > { %2413 = vrsqrt.f32 %v1737_v37  ;;  %vm1740_vm8 = vcmp.eq.f32.partialorder %v1737_v37, inf  ;;  %v1743_v40 = vand.u32 2147483648, %v1737_v37  ;;  %vm1742_vm9 = vcmp.eq.f32.partialorder %v1737_v37, 0.0 }
 0x8a7   : > { %v2414_v38 = vpop.eup %2413 }
 0x8a8   : > { %v1739_v39 = vmul.f32 %v2414_v38, %v1737_v37 }
 0x8aa   : > { %v1741_v41 = vsel %vm1740_vm8, %v1737_v37, %v1739_v39 }
 0x8ab   : > { %v1744_v42 = vsel %vm1742_vm9, %v1743_v40, %v1741_v41 }
 0x8ac   : > { %1751 = vst.msk [vmem:[%s3182_s14 + $0x5] sm:$0x1] %vm1745_vm1, %v1744_v42 }
 0x8ad   : > { %2656 = shalt.err (!%p2653_p3)
}
 0x8ae   : > { %s2657_s6 = scalar_lea.hbm %s3335_s21, 128  ;;  %s2661_s22 = scalar_lea.hbm %s3389_s8, 256 }
 0x8af   : > { %p2658_p12 = scmp.ne.s32.totalorder %s3335_s21, %s2657_s6  ;;  %p2662_p0 = scmp.lt.u32.totalorder %s3335_s21, %s3389_s8 }
 0x8b0   : > { %p2663_p6 = scmp.lt.u32.totalorder %s2661_s22, %s2657_s6  ;;  %p2665_p4 = scmp.lt.u32.totalorder %s2657_s6, %s3335_s21 }
 0x8b1   : > { %p2659_p1 = pnand %p2658_p12, %p3432_p10 }
 0x8b2   : > { %p2664_p2 = por %p2663_p6, %p2662_p0 }
 0x8b3   : > { %p2660_p13 = pneg %p2659_p1 }
 0x8b4   : > { %p2666_p5 = por %p2665_p4, %p2664_p2 }
 0x8b6   : > { %p2667_p7 = pnand %p2666_p5, %p2660_p13 }
 0x8b8   : > { %2670 = shalt.err (!%p2667_p7)
}
 0x8b9   : > { %2292 = dma.vmem_to_hbm [thread:$0]  (%p3432_p10), %s3337_s26, 128, %s3335_s21, %s1755_s11  }
 0x8ba PF: > { %s1780_s12 = sand.u32 1, %s2717_s27   ;;  %p3433_p9 = scmp.ne.s32.totalorder %s3415_s25, 0 }
 0x8bb   : > { %p3434_p8 = scmp.ge.s32.totalorder %s2729_s30, 2  ;;  %s1781_s2 = scalar_lea.sflag [#allocation4], %s1780_s12 }
 0x8bd   : > { %p2321_p11 = pnand %p3434_p8, %p3433_p9 }
 0x8bf   : > { %2712 = dma.done.wait (!%p2321_p11), %s1781_s2, 128  }
 0x8c0   : > { %2714 = vsyncadd (!%p2321_p11), %s1781_s2, 4294967168  ;;  %p27_p3 = scmp.ge.s32.totalorder %s2984_s23, 4   ;;  %s3435_s27 = smov %s2721_s28 }
 0x8c1   : > { %s3436_s28 = smov %s2725_s29  ;;  %s3437_s29 = smov %s2995_s18 }
 0x8c2   : > { %s3438_s30 = smov %s2984_s23  ;;  %29 = sbr.rel (!%p27_p3) target bundleno = 17 (0x11), region = 134 }
 0x8c9   :  { %1786 = vsyncpa [#allocation3], 1 }
 0x8ca   :  { %1788 = vsyncpa [#allocation3 + $0x1], 1 }
 0x8cb   :  { %1789 = vsyncpa [#allocation6], 1 }
 0x8cc   :  { %1791 = vsyncpa [#allocation6 + $0x1], 1 }
 0x8cd   :  { %1792 = vsyncpa [#allocation9], 1 }
 0x8ce   :  { %1793 = vsyncpa [#allocation12], 1 }
 0x8cf   :  { %1794 = vsyncpa [#allocation15], 1 }
 0x8d0   :  { %1795 = vsyncpa [#allocation4], 1 }
 0x8d1   :  { %1797 = vsyncpa [#allocation4 + $0x1], 1 }

</bundles_post_ra>
